<compile_context>
chip_gen: v5e
topology: v5e:2x2
jax: 0.10.0
libtpu: 0.0.40
codegen_flags: <defaults>
</compile_context>

<pallas_src>
import functools

import jax
import jax.numpy as jnp
import numpy as np
from jax.experimental import pallas as pl
from jax.experimental.pallas import tpu as pltpu

NEG_BIG = 1e12


def _round_up(x, m):
    return ((x + m - 1) // m) * m


def _vmem_capacity_bytes():
    """Physical VMEM per TensorCore; conservative fallback if query fails."""
    try:
        info = pltpu.get_tpu_info()
        cap = getattr(info, "vmem_capacity_bytes", None)
        if cap:
            return int(cap)
    except Exception:
        pass
    return 64 << 20  # v7x per-TensorCore VMEM (smallest of the three gens)


def _egp_kernel(*refs, rope, tril, hs, heads, th, s_q, scale):
    """Grid = (batch, head_block). Heavy per-batch work only at head_block 0."""
    n_hb = heads // th
    it = iter(refs)
    x_ref = next(it)          # [1, S_kv, H]
    mrow_ref = next(it)       # [1, 1, S_kv]
    mcol_ref = next(it)       # [1, S_q, 1]
    w1_ref = next(it)         # [H, 2*hs]
    b1_ref = next(it)         # [1, 2*hs]
    w2_ref = next(it)         # [2*hs, 2*heads]
    b2_ref = next(it)         # [1, 2*heads]
    cos_ref = next(it) if rope else None
    sin_ref = next(it) if rope else None
    tril_ref = next(it) if tril else None
    out_ref = next(it)        # [1, TH, S_q, S_kv]
    base_ref = next(it)       # [S_q, S_kv]            (scratch)
    biasA_ref = next(it)      # [n_hb, TH, S_kv]       (scratch, row broadcast)
    biasB_ref = next(it)      # [n_hb, S_q, TH]        (scratch, col broadcast)

    hb = pl.program_id(1)

    @pl.when(hb == 0)
    def _():
        x = x_ref[0]                                                      # [S_kv, H]
        # fused dense1: columns are [qw (rotate-half order) | kw (rotate-half order)]
        d1 = jnp.dot(x, w1_ref[...], preferred_element_type=jnp.float32) + b1_ref[...]

        # fused dense2 on the pre-RoPE features: columns [A channels | B channels]
        bias_all = (jnp.dot(d1, w2_ref[...], preferred_element_type=jnp.float32)
                    + b2_ref[...]) * 0.5                                  # [S_kv, 2*heads]
        bias_T = jnp.transpose(bias_all)                                  # [2*heads, S_kv]
        for g in range(n_hb):                                             # once per batch
            biasA_ref[g] = bias_T[g * th:(g + 1) * th, :]                 # [TH, S_kv]
            biasB_ref[g] = bias_all[:s_q, heads + g * th:heads + (g + 1) * th]  # [S_q, TH]

        qw = d1[:s_q, :hs]                                                # [S_q, hs]
        kw = d1[:, hs:]                                                   # [S_kv, hs]
        if rope:
            cos = cos_ref[...]                                            # [S_kv, hs//2]
            sin = sin_ref[...]

            def _rot(v, c, s):
                v1, v2 = v[:, :hs // 2], v[:, hs // 2:]
                return jnp.concatenate([v1 * c - v2 * s, v2 * c + v1 * s], axis=1)

            qw = _rot(qw, cos[:s_q], sin[:s_q])
            kw = _rot(kw, cos, sin)

        # qw @ kw^T without materializing kw.T (MXU consumes transposed rhs)
        qk = jax.lax.dot_general(qw, kw, (((1,), (1,)), ((), ())),
                                 preferred_element_type=jnp.float32) * scale   # [S_q, S_kv]

        neg = (1.0 - mcol_ref[0] * mrow_ref[0]) * NEG_BIG                 # [S_q, S_kv]
        if tril:
            neg = neg + tril_ref[...]                                     # precomputed tril*NEG
        base_ref[...] = qk - neg

    # per-head-block epilogue: broadcast adds only (no transposes, no iotas)
    base = base_ref[...]
    rowA = biasA_ref[hb]                                                  # [TH, S_kv]
    colB = biasB_ref[hb]                                                  # [S_q, TH]
    for t in range(th):
        out_ref[0, t] = (base + rowA[t:t + 1, :] + colB[:, t:t + 1]).astype(out_ref.dtype)


def egp_forward(params, x, mask, *, heads, head_size, rope, tril,
                out_dtype=jnp.float32, trim_padding=True):
    """EfficientGlobalPointer forward via Pallas. x: [B, S, H], mask: [B, S] float."""
    B, S, H = x.shape
    hs = head_size
    assert (not rope) or hs % 2 == 0
    S_kv = _round_up(S, 128)    # lane (column) dim -> lane-dense (unmasked) stores
    S_q = _round_up(S, 8)       # sublane (row) dim -> only pad to 8, no wasted rows

    xp = jnp.pad(x, ((0, 0), (0, S_kv - S), (0, 0)))
    mrow = jnp.pad(mask, ((0, 0), (0, S_kv - S)))[:, None, :]             # [B, 1, S_kv]
    mcol = jnp.pad(mask, ((0, 0), (0, S_q - S)))[:, :, None]              # [B, S_q, 1]

    W1, b1, W2, b2 = params["W1"], params["b1"], params["W2"], params["b2"]

    # ---- glue: de-interleave + rotate-half permute the weights in the wrapper ----
    # original qw feature d = dense1 column 2d; rotate-half order = evens then odds.
    perm = np.concatenate([np.arange(0, hs, 2), np.arange(1, hs, 2)])
    q_cols = 2 * perm
    k_cols = 2 * perm + 1

    W1f = jnp.concatenate([W1[:, q_cols], W1[:, k_cols]], axis=1)         # [H, 2*hs]
    b1f = jnp.concatenate([b1[q_cols], b1[k_cols]]).reshape(1, 2 * hs)

    row_perm = np.concatenate([q_cols, k_cols])
    col_perm = np.concatenate([np.arange(0, 2 * heads, 2), np.arange(1, 2 * heads, 2)])
    W2f = W2[row_perm][:, col_perm]                                       # [2*hs, 2*heads]
    b2f = b2[col_perm].reshape(1, 2 * heads)

    args = [xp, mrow, mcol, W1f, b1f, W2f, b2f]
    in_specs = [
        pl.BlockSpec((1, S_kv, H), lambda b, h: (b, 0, 0)),               # x
        pl.BlockSpec((1, 1, S_kv), lambda b, h: (b, 0, 0)),               # mask (row)
        pl.BlockSpec((1, S_q, 1), lambda b, h: (b, 0, 0)),                # mask (col)
        pl.BlockSpec((H, 2 * hs), lambda b, h: (0, 0)),                   # W1f
        pl.BlockSpec((1, 2 * hs), lambda b, h: (0, 0)),                   # b1f
        pl.BlockSpec((2 * hs, 2 * heads), lambda b, h: (0, 0)),           # W2f
        pl.BlockSpec((1, 2 * heads), lambda b, h: (0, 0)),                # b2f
    ]
    if rope:
        pos = jnp.arange(S_kv, dtype=jnp.float32)
        idx = jnp.arange(hs // 2, dtype=jnp.float32)
        theta = jnp.power(10000.0, -2.0 * idx / hs)
        ang = pos[:, None] * theta[None, :]                               # [S_kv, hs//2]
        args += [jnp.cos(ang), jnp.sin(ang)]
        in_specs += [pl.BlockSpec((S_kv, hs // 2), lambda b, h: (0, 0)),
                     pl.BlockSpec((S_kv, hs // 2), lambda b, h: (0, 0))]
    if tril:
        row = jax.lax.broadcasted_iota(jnp.int32, (S_q, S_kv), 0)
        col = jax.lax.broadcasted_iota(jnp.int32, (S_q, S_kv), 1)
        tril_neg = jnp.where(row > col, jnp.float32(NEG_BIG), jnp.float32(0.0))
        args.append(tril_neg)
        in_specs.append(pl.BlockSpec((S_q, S_kv), lambda b, h: (0, 0)))   # constant block

    # ---- VMEM budgeting: pick head-block size TH, clamp limit to physical VMEM ----
    out_bytes = jnp.dtype(out_dtype).itemsize
    fixed = 4 * (3 * S_q * S_kv                       # base scratch + qk/neg temporaries
                 + heads * (S_kv + S_q)               # bias scratches
                 + 2 * S_kv * H                       # double-buffered x tile
                 + S_kv * (4 * hs + 2 * heads)        # d1 / rotated qw,kw / bias_all temps
                 + H * 2 * hs + 4 * hs * heads        # weights
                 + 2 * S_kv * max(hs // 2, 1))        # rope tables
    if tril:
        fixed += 4 * S_q * S_kv
    cap = _vmem_capacity_bytes()
    budget = int(cap * 0.9)
    TH = 1
    for th in range(1, min(heads, 8) + 1):
        if heads % th == 0 and fixed + 2 * th * S_q * S_kv * out_bytes <= budget:
            TH = th
    n_hb = heads // TH

    vmem_limit = fixed + 2 * TH * S_q * S_kv * out_bytes + (4 << 20)
    vmem_limit = int(min(max(vmem_limit, 32 << 20), budget))

    kernel = functools.partial(_egp_kernel, rope=rope, tril=tril, hs=hs,
                               heads=heads, th=TH, s_q=S_q,
                               scale=1.0 / (hs ** 0.5))

    out = pl.pallas_call(
        kernel,
        out_shape=jax.ShapeDtypeStruct((B, heads, S_q, S_kv), out_dtype),
        grid_spec=pltpu.PrefetchScalarGridSpec(
            num_scalar_prefetch=0,
            grid=(B, n_hb),
            in_specs=in_specs,
            out_specs=pl.BlockSpec((1, TH, S_q, S_kv), lambda b, h: (b, h, 0, 0)),
            scratch_shapes=[pltpu.VMEM((S_q, S_kv), jnp.float32),         # qk - mask base
                            pltpu.VMEM((n_hb, TH, S_kv), jnp.float32),    # biasA (transposed)
                            pltpu.VMEM((n_hb, S_q, TH), jnp.float32)],    # biasB (natural)
        ),
        compiler_params=pltpu.CompilerParams(
            dimension_semantics=("parallel", "arbitrary"),
            vmem_limit_bytes=vmem_limit),
    )(*args)

    if trim_padding and (S_q != S or S_kv != S):
        # NOTE: for production, prefer trim_padding=False and consume the padded
        # logits directly (padded rows/cols are already ~-1e12), since this slice
        # re-reads/re-writes the largest tensor.
        out = out[:, :, :S, :S]
    return out


def gplinker_forward(params, chars, mask_tensor, *, num_tags, head_size,
                     out_dtype=jnp.float32, trim_padding=True):
    """GPLinker._forward with target=None: returns (entity, head, tail).

    out_dtype=jnp.bfloat16 halves the HBM-write-bound output traffic (the kernel
    is output-write bound on v5e/v6e/v7x); default f32 preserves the PyTorch
    module semantics.
    """
    entity = egp_forward(params["entity"], chars, mask_tensor, heads=2,
                         head_size=head_size, rope=True, tril=True,
                         out_dtype=out_dtype, trim_padding=trim_padding)
    head = egp_forward(params["head"], chars, mask_tensor, heads=num_tags,
                       head_size=head_size, rope=False, tril=False,
                       out_dtype=out_dtype, trim_padding=trim_padding)
    tail = egp_forward(params["tail"], chars, mask_tensor, heads=num_tags,
                       head_size=head_size, rope=False, tril=False,
                       out_dtype=out_dtype, trim_padding=trim_padding)
    return entity, head, tail


# ----------------------------- pure-JAX reference -----------------------------
def _egp_ref(params, x, mask, *, rope, tril, head_size):
    inputs = x @ params["W1"] + params["b1"]
    qw, kw = inputs[..., 0::2], inputs[..., 1::2]
    if rope:
        S = x.shape[1]
        pos_ids = jnp.arange(S, dtype=jnp.float32)
        idx = jnp.arange(head_size // 2, dtype=jnp.float32)
        theta = jnp.power(10000.0, -2.0 * idx / head_size)
        ang = pos_ids[:, None] * theta[None, :]
        emb = jnp.stack([jnp.sin(ang), jnp.cos(ang)], axis=-1).reshape(S, head_size)[None]
        cos_pos = jnp.repeat(emb[..., 1::2], 2, axis=-1)
        sin_pos = jnp.repeat(emb[..., 0::2], 2, axis=-1)
        qw2 = jnp.stack([-qw[..., 1::2], qw[..., 0::2]], axis=-1).reshape(qw.shape)
        qw = qw * cos_pos + qw2 * sin_pos
        kw2 = jnp.stack([-kw[..., 1::2], kw[..., 0::2]], axis=-1).reshape(kw.shape)
        kw = kw * cos_pos + kw2 * sin_pos
    logits = jnp.einsum("bmd,bnd->bmn", qw, kw) / head_size ** 0.5
    bias = jnp.swapaxes(inputs @ params["W2"] + params["b2"], 1, 2) / 2
    logits = logits[:, None] + bias[:, 0::2, None] + bias[:, 1::2, :, None]
    attn = 1.0 - mask[:, None, None, :] * mask[:, None, :, None]
    logits = logits - attn * NEG_BIG
    if tril:
        S = x.shape[1]
        tri = jnp.tril(jnp.ones((S, S), jnp.float32), k=-1)
        logits = logits - tri * NEG_BIG
    return logits


def _make_egp_params(key, hidden, head_size, heads):
    k1, k2, k3, k4 = jax.random.split(key, 4)
    return {
        "W1": jax.random.normal(k1, (hidden, 2 * head_size), jnp.float32) / (hidden ** 0.5),
        "b1": jax.random.normal(k2, (2 * head_size,), jnp.float32) * 0.02,
        "W2": jax.random.normal(k3, (2 * head_size, 2 * heads), jnp.float32) / ((2 * head_size) ** 0.5),
        "b2": jax.random.normal(k4, (2 * heads,), jnp.float32) * 0.02,
    }


if __name__ == "__main__":
    B, S, H = 2, 8, 32
    HEAD_SIZE = 16
    NUM_TAGS = 3

    key = jax.random.PRNGKey(0)
    k_chars, k_e, k_h, k_t = jax.random.split(key, 4)

    chars = jax.random.normal(k_chars, (B, S, H), jnp.float32)
    mask_tensor = jnp.array([[1.0] * S,
                             [1.0] * 6 + [0.0] * (S - 6)], dtype=jnp.float32)

    params = {
        "entity": _make_egp_params(k_e, H, HEAD_SIZE, 2),
        "head": _make_egp_params(k_h, H, HEAD_SIZE, NUM_TAGS),
        "tail": _make_egp_params(k_t, H, HEAD_SIZE, NUM_TAGS),
    }

    entity, head, tail = gplinker_forward(params, chars, mask_tensor,
                                          num_tags=NUM_TAGS, head_size=HEAD_SIZE)
    jax.block_until_ready((entity, head, tail))

    # correctness check against pure-JAX reference of the PyTorch semantics
    ref_entity = _egp_ref(params["entity"], chars, mask_tensor,
                          rope=True, tril=True, head_size=HEAD_SIZE)
    ref_head = _egp_ref(params["head"], chars, mask_tensor,
                        rope=False, tril=False, head_size=HEAD_SIZE)
    ref_tail = _egp_ref(params["tail"], chars, mask_tensor,
                        rope=False, tril=False, head_size=HEAD_SIZE)
    np.testing.assert_allclose(np.asarray(entity), np.asarray(ref_entity), rtol=2e-4, atol=1e-2)
    np.testing.assert_allclose(np.asarray(head), np.asarray(ref_head), rtol=2e-4, atol=1e-2)
    np.testing.assert_allclose(np.asarray(tail), np.asarray(ref_tail), rtol=2e-4, atol=1e-2)

    # bf16 / padded-output fast path (halves HBM write traffic); smoke run only.
    ent_bf16 = egp_forward(params["entity"], chars, mask_tensor, heads=2,
                           head_size=HEAD_SIZE, rope=True, tril=True,
                           out_dtype=jnp.bfloat16, trim_padding=False)
    jax.block_until_ready(ent_bf16)

    print("KERNEL_OK")
</pallas_src>

<mosaic_0001>
module attributes {stable_mosaic.version = 11 : i64} {
  func.func @_egp_kernel(%arg0: i32, %arg1: i32, %arg2: memref<1x128x32xf32, #tpu.memory_space<vmem>>, %arg3: memref<1x1x128xf32, #tpu.memory_space<vmem>>, %arg4: memref<1x8x1xf32, #tpu.memory_space<vmem>>, %arg5: memref<32x32xf32, #tpu.memory_space<vmem>>, %arg6: memref<1x32xf32, #tpu.memory_space<vmem>>, %arg7: memref<32x4xf32, #tpu.memory_space<vmem>>, %arg8: memref<1x4xf32, #tpu.memory_space<vmem>>, %arg9: memref<128x8xf32, #tpu.memory_space<vmem>>, %arg10: memref<128x8xf32, #tpu.memory_space<vmem>>, %arg11: memref<8x128xf32, #tpu.memory_space<vmem>>, %arg12: memref<1x2x8x128xf32, #tpu.memory_space<vmem>>, %arg13: memref<8x128xf32, #tpu.memory_space<vmem>>, %arg14: memref<1x2x128xf32, #tpu.memory_space<vmem>>, %arg15: memref<1x8x2xf32, #tpu.memory_space<vmem>>) attributes {dimension_semantics = [#tpu.dimension_semantics<parallel>, #tpu.dimension_semantics<arbitrary>], iteration_bounds = array<i64: 2, 1>, scalar_prefetch = 0 : i64, scratch_operands = 3 : i64, tpu.core_type = #tpu.core_type<tc>, window_params = [{transform_indices = @transform_0, window_bounds = array<i64: 1, 128, 32>}, {transform_indices = @transform_1, window_bounds = array<i64: 1, 1, 128>}, {transform_indices = @transform_2, window_bounds = array<i64: 1, 8, 1>}, {pipeline_mode = #tpu.pipeline_mode<synchronous>, transform_indices = @transform_3, window_bounds = array<i64: 32, 32>}, {pipeline_mode = #tpu.pipeline_mode<synchronous>, transform_indices = @transform_4, window_bounds = array<i64: 1, 32>}, {pipeline_mode = #tpu.pipeline_mode<synchronous>, transform_indices = @transform_5, window_bounds = array<i64: 32, 4>}, {pipeline_mode = #tpu.pipeline_mode<synchronous>, transform_indices = @transform_6, window_bounds = array<i64: 1, 4>}, {pipeline_mode = #tpu.pipeline_mode<synchronous>, transform_indices = @transform_7, window_bounds = array<i64: 128, 8>}, {pipeline_mode = #tpu.pipeline_mode<synchronous>, transform_indices = @transform_8, window_bounds = array<i64: 128, 8>}, {pipeline_mode = #tpu.pipeline_mode<synchronous>, transform_indices = @transform_9, window_bounds = array<i64: 8, 128>}, {transform_indices = @transform_10, window_bounds = array<i64: 1, 2, 8, 128>}]} {
    %c0_i32 = arith.constant 0 : i32
    %0 = arith.cmpi eq, %arg1, %c0_i32 : i32
    %1 = arith.extui %0 : i1 to i32
    %c0_i32_0 = arith.constant 0 : i32
    %2 = arith.cmpi ne, %1, %c0_i32_0 : i32
    scf.if %2 {
      %c0_13 = arith.constant 0 : index
      %c0_14 = arith.constant 0 : index
      %c0_15 = arith.constant 0 : index
      %28 = vector.load %arg2[%c0_13, %c0_14, %c0_15] : memref<1x128x32xf32, #tpu.memory_space<vmem>>, vector<1x128x32xf32>
      %29 = vector.shape_cast %28 : vector<1x128x32xf32> to vector<128x32xf32>
      %c0_16 = arith.constant 0 : index
      %c0_17 = arith.constant 0 : index
      %30 = vector.load %arg5[%c0_16, %c0_17] : memref<32x32xf32, #tpu.memory_space<vmem>>, vector<32x32xf32>
      %cst = arith.constant dense<0.000000e+00> : vector<128x32xf32>
      %31 = tpu.matmul %29, %30, %cst {dimension_numbers = #tpu.dot_dimension_numbers<[1], [0], [0], [1], [0, 0, 1, 1], [], []>} : vector<128x32xf32>, vector<32x32xf32>, vector<128x32xf32> -> vector<128x32xf32>
      %c0_18 = arith.constant 0 : index
      %c0_19 = arith.constant 0 : index
      %32 = vector.load %arg6[%c0_18, %c0_19] : memref<1x32xf32, #tpu.memory_space<vmem>>, vector<1x32xf32>
      %33 = vector.broadcast %32 : vector<1x32xf32> to vector<128x32xf32>
      %34 = arith.addf %31, %33 : vector<128x32xf32>
      %c0_20 = arith.constant 0 : index
      %c0_21 = arith.constant 0 : index
      %35 = vector.load %arg7[%c0_20, %c0_21] : memref<32x4xf32, #tpu.memory_space<vmem>>, vector<32x4xf32>
      %cst_22 = arith.constant dense<0.000000e+00> : vector<128x4xf32>
      %36 = tpu.matmul %34, %35, %cst_22 {dimension_numbers = #tpu.dot_dimension_numbers<[1], [0], [0], [1], [0, 0, 1, 1], [], []>} : vector<128x32xf32>, vector<32x4xf32>, vector<128x4xf32> -> vector<128x4xf32>
      %c0_23 = arith.constant 0 : index
      %c0_24 = arith.constant 0 : index
      %37 = vector.load %arg8[%c0_23, %c0_24] : memref<1x4xf32, #tpu.memory_space<vmem>>, vector<1x4xf32>
      %38 = vector.broadcast %37 : vector<1x4xf32> to vector<128x4xf32>
      %39 = arith.addf %36, %38 : vector<128x4xf32>
      %cst_25 = arith.constant 5.000000e-01 : f32
      %40 = vector.broadcast %cst_25 : f32 to vector<128x4xf32>
      %41 = arith.mulf %39, %40 : vector<128x4xf32>
      %42 = tpu.transpose %41, [1, 0] : vector<128x4xf32> -> vector<4x128xf32>
      %43 = vector.extract_strided_slice %42 {offsets = [0, 0], sizes = [2, 128], strides = [1, 1]} : vector<4x128xf32> to vector<2x128xf32>
      %c0_26 = arith.constant 0 : index
      %c0_27 = arith.constant 0 : index
      %c0_28 = arith.constant 0 : index
      %44 = vector.load %arg14[%c0_26, %c0_27, %c0_28] : memref<1x2x128xf32, #tpu.memory_space<vmem>>, vector<1x2x128xf32>
      %45 = vector.shape_cast %44 : vector<1x2x128xf32> to vector<2x128xf32>
      %46 = vector.shape_cast %43 : vector<2x128xf32> to vector<1x2x128xf32>
      tpu.vector_store %arg14[%c0_26, %c0_27, %c0_28], %46 {strides = array<i32>} : memref<1x2x128xf32, #tpu.memory_space<vmem>>, vector<1x2x128xf32>,
      %47 = vector.extract_strided_slice %41 {offsets = [0, 2], sizes = [8, 2], strides = [1, 1]} : vector<128x4xf32> to vector<8x2xf32>
      %c0_29 = arith.constant 0 : index
      %c0_30 = arith.constant 0 : index
      %c0_31 = arith.constant 0 : index
      %48 = vector.load %arg15[%c0_29, %c0_30, %c0_31] : memref<1x8x2xf32, #tpu.memory_space<vmem>>, vector<1x8x2xf32>
      %49 = vector.shape_cast %48 : vector<1x8x2xf32> to vector<8x2xf32>
      %50 = vector.shape_cast %47 : vector<8x2xf32> to vector<1x8x2xf32>
      tpu.vector_store %arg15[%c0_29, %c0_30, %c0_31], %50 {strides = array<i32>} : memref<1x8x2xf32, #tpu.memory_space<vmem>>, vector<1x8x2xf32>,
      %51 = vector.extract_strided_slice %34 {offsets = [0, 0], sizes = [8, 16], strides = [1, 1]} : vector<128x32xf32> to vector<8x16xf32>
      %52 = vector.extract_strided_slice %34 {offsets = [0, 16], sizes = [128, 16], strides = [1, 1]} : vector<128x32xf32> to vector<128x16xf32>
      %c0_32 = arith.constant 0 : index
      %c0_33 = arith.constant 0 : index
      %53 = vector.load %arg9[%c0_32, %c0_33] : memref<128x8xf32, #tpu.memory_space<vmem>>, vector<128x8xf32>
      %c0_34 = arith.constant 0 : index
      %c0_35 = arith.constant 0 : index
      %54 = vector.load %arg10[%c0_34, %c0_35] : memref<128x8xf32, #tpu.memory_space<vmem>>, vector<128x8xf32>
      %55 = vector.extract_strided_slice %53 {offsets = [0, 0], sizes = [8, 8], strides = [1, 1]} : vector<128x8xf32> to vector<8x8xf32>
      %56 = vector.extract_strided_slice %54 {offsets = [0, 0], sizes = [8, 8], strides = [1, 1]} : vector<128x8xf32> to vector<8x8xf32>
      %57 = vector.extract_strided_slice %51 {offsets = [0, 0], sizes = [8, 8], strides = [1, 1]} : vector<8x16xf32> to vector<8x8xf32>
      %58 = vector.extract_strided_slice %51 {offsets = [0, 8], sizes = [8, 8], strides = [1, 1]} : vector<8x16xf32> to vector<8x8xf32>
      %59 = arith.mulf %57, %55 : vector<8x8xf32>
      %60 = arith.mulf %58, %56 : vector<8x8xf32>
      %61 = arith.subf %59, %60 : vector<8x8xf32>
      %62 = arith.mulf %58, %55 : vector<8x8xf32>
      %63 = arith.mulf %57, %56 : vector<8x8xf32>
      %64 = arith.addf %62, %63 : vector<8x8xf32>
      %65 = tpu.concatenate %61, %64 in 1 : vector<8x8xf32>, vector<8x8xf32> -> vector<8x16xf32>
      %66 = vector.extract_strided_slice %52 {offsets = [0, 0], sizes = [128, 8], strides = [1, 1]} : vector<128x16xf32> to vector<128x8xf32>
      %67 = vector.extract_strided_slice %52 {offsets = [0, 8], sizes = [128, 8], strides = [1, 1]} : vector<128x16xf32> to vector<128x8xf32>
      %68 = arith.mulf %66, %53 : vector<128x8xf32>
      %69 = arith.mulf %67, %54 : vector<128x8xf32>
      %70 = arith.subf %68, %69 : vector<128x8xf32>
      %71 = arith.mulf %67, %53 : vector<128x8xf32>
      %72 = arith.mulf %66, %54 : vector<128x8xf32>
      %73 = arith.addf %71, %72 : vector<128x8xf32>
      %74 = tpu.concatenate %70, %73 in 1 : vector<128x8xf32>, vector<128x8xf32> -> vector<128x16xf32>
      %cst_36 = arith.constant dense<0.000000e+00> : vector<8x128xf32>
      %75 = tpu.matmul %65, %74, %cst_36 {dimension_numbers = #tpu.dot_dimension_numbers<[1], [1], [0], [0], [0, 0, 1, 0], [], []>} : vector<8x16xf32>, vector<128x16xf32>, vector<8x128xf32> -> vector<8x128xf32>
      %cst_37 = arith.constant 2.500000e-01 : f32
      %76 = vector.broadcast %cst_37 : f32 to vector<8x128xf32>
      %77 = arith.mulf %75, %76 : vector<8x128xf32>
      %c0_38 = arith.constant 0 : index
      %c0_39 = arith.constant 0 : index
      %c0_40 = arith.constant 0 : index
      %78 = vector.load %arg4[%c0_38, %c0_39, %c0_40] : memref<1x8x1xf32, #tpu.memory_space<vmem>>, vector<1x8x1xf32>
      %79 = vector.shape_cast %78 : vector<1x8x1xf32> to vector<8x1xf32>
      %c0_41 = arith.constant 0 : index
      %c0_42 = arith.constant 0 : index
      %c0_43 = arith.constant 0 : index
      %80 = vector.load %arg3[%c0_41, %c0_42, %c0_43] : memref<1x1x128xf32, #tpu.memory_space<vmem>>, vector<1x1x128xf32>
      %81 = vector.shape_cast %80 : vector<1x1x128xf32> to vector<1x128xf32>
      %82 = vector.broadcast %79 : vector<8x1xf32> to vector<8x128xf32>
      %83 = vector.broadcast %81 : vector<1x128xf32> to vector<8x128xf32>
      %84 = arith.mulf %82, %83 : vector<8x128xf32>
      %cst_44 = arith.constant 1.000000e+00 : f32
      %85 = vector.broadcast %cst_44 : f32 to vector<8x128xf32>
      %86 = arith.subf %85, %84 : vector<8x128xf32>
      %cst_45 = arith.constant 9.99999995E+11 : f32
      %87 = vector.broadcast %cst_45 : f32 to vector<8x128xf32>
      %88 = arith.mulf %86, %87 : vector<8x128xf32>
      %c0_46 = arith.constant 0 : index
      %c0_47 = arith.constant 0 : index
      %89 = vector.load %arg11[%c0_46, %c0_47] : memref<8x128xf32, #tpu.memory_space<vmem>>, vector<8x128xf32>
      %90 = arith.addf %88, %89 : vector<8x128xf32>
      %91 = arith.subf %77, %90 : vector<8x128xf32>
      %c0_48 = arith.constant 0 : index
      %c0_49 = arith.constant 0 : index
      %92 = vector.load %arg13[%c0_48, %c0_49] : memref<8x128xf32, #tpu.memory_space<vmem>>, vector<8x128xf32>
      tpu.vector_store %arg13[%c0_48, %c0_49], %91 {strides = array<i32>} : memref<8x128xf32, #tpu.memory_space<vmem>>, vector<8x128xf32>,
    } else {
    }
    %c0 = arith.constant 0 : index
    %c0_1 = arith.constant 0 : index
    %3 = vector.load %arg13[%c0, %c0_1] : memref<8x128xf32, #tpu.memory_space<vmem>>, vector<8x128xf32>
    %4 = arith.index_cast %arg1 : i32 to index
    %c0_2 = arith.constant 0 : index
    %c0_3 = arith.constant 0 : index
    %5 = vector.load %arg14[%4, %c0_2, %c0_3] : memref<1x2x128xf32, #tpu.memory_space<vmem>>, vector<1x2x128xf32>
    %6 = vector.shape_cast %5 : vector<1x2x128xf32> to vector<2x128xf32>
    %7 = arith.index_cast %arg1 : i32 to index
    %c0_4 = arith.constant 0 : index
    %c0_5 = arith.constant 0 : index
    %8 = vector.load %arg15[%7, %c0_4, %c0_5] : memref<1x8x2xf32, #tpu.memory_space<vmem>>, vector<1x8x2xf32>
    %9 = vector.shape_cast %8 : vector<1x8x2xf32> to vector<8x2xf32>
    %10 = vector.extract_strided_slice %6 {offsets = [0, 0], sizes = [1, 128], strides = [1, 1]} : vector<2x128xf32> to vector<1x128xf32>
    %11 = vector.broadcast %10 : vector<1x128xf32> to vector<8x128xf32>
    %12 = arith.addf %3, %11 : vector<8x128xf32>
    %13 = vector.extract_strided_slice %9 {offsets = [0, 0], sizes = [8, 1], strides = [1, 1]} : vector<8x2xf32> to vector<8x1xf32>
    %14 = vector.broadcast %13 : vector<8x1xf32> to vector<8x128xf32>
    %15 = arith.addf %12, %14 : vector<8x128xf32>
    %c0_6 = arith.constant 0 : index
    %c0_7 = arith.constant 0 : index
    %c0_8 = arith.constant 0 : index
    %c0_9 = arith.constant 0 : index
    %16 = vector.load %arg12[%c0_6, %c0_7, %c0_8, %c0_9] : memref<1x2x8x128xf32, #tpu.memory_space<vmem>>, vector<1x1x8x128xf32>
    %17 = vector.shape_cast %16 : vector<1x1x8x128xf32> to vector<8x128xf32>
    %18 = vector.shape_cast %15 : vector<8x128xf32> to vector<1x1x8x128xf32>
    tpu.vector_store %arg12[%c0_6, %c0_7, %c0_8, %c0_9], %18 {strides = array<i32>} : memref<1x2x8x128xf32, #tpu.memory_space<vmem>>, vector<1x1x8x128xf32>,
    %19 = vector.extract_strided_slice %6 {offsets = [1, 0], sizes = [1, 128], strides = [1, 1]} : vector<2x128xf32> to vector<1x128xf32>
    %20 = vector.broadcast %19 : vector<1x128xf32> to vector<8x128xf32>
    %21 = arith.addf %3, %20 : vector<8x128xf32>
    %22 = vector.extract_strided_slice %9 {offsets = [0, 1], sizes = [8, 1], strides = [1, 1]} : vector<8x2xf32> to vector<8x1xf32>
    %23 = vector.broadcast %22 : vector<8x1xf32> to vector<8x128xf32>
    %24 = arith.addf %21, %23 : vector<8x128xf32>
    %c0_10 = arith.constant 0 : index
    %c1 = arith.constant 1 : index
    %c0_11 = arith.constant 0 : index
    %c0_12 = arith.constant 0 : index
    %25 = vector.load %arg12[%c0_10, %c1, %c0_11, %c0_12] : memref<1x2x8x128xf32, #tpu.memory_space<vmem>>, vector<1x1x8x128xf32>
    %26 = vector.shape_cast %25 : vector<1x1x8x128xf32> to vector<8x128xf32>
    %27 = vector.shape_cast %24 : vector<8x128xf32> to vector<1x1x8x128xf32>
    tpu.vector_store %arg12[%c0_10, %c1, %c0_11, %c0_12], %27 {strides = array<i32>} : memref<1x2x8x128xf32, #tpu.memory_space<vmem>>, vector<1x1x8x128xf32>,
    return
  }
  func.func @transform_0(%arg0: i32, %arg1: i32) -> (i32, i32, i32) {
    %c0_i32 = arith.constant 0 : i32
    %c0_i32_0 = arith.constant 0 : i32
    %c0_i32_1 = arith.constant 0 : i32
    return %arg0, %c0_i32, %c0_i32_0 : i32, i32, i32
  }
  func.func @transform_1(%arg0: i32, %arg1: i32) -> (i32, i32, i32) {
    %c0_i32 = arith.constant 0 : i32
    %c0_i32_0 = arith.constant 0 : i32
    %c0_i32_1 = arith.constant 0 : i32
    return %arg0, %c0_i32, %c0_i32_0 : i32, i32, i32
  }
  func.func @transform_2(%arg0: i32, %arg1: i32) -> (i32, i32, i32) {
    %c0_i32 = arith.constant 0 : i32
    %c0_i32_0 = arith.constant 0 : i32
    %c0_i32_1 = arith.constant 0 : i32
    return %arg0, %c0_i32, %c0_i32_0 : i32, i32, i32
  }
  func.func @transform_3(%arg0: i32, %arg1: i32) -> (i32, i32) {
    %c0_i32 = arith.constant 0 : i32
    %c0_i32_0 = arith.constant 0 : i32
    %c0_i32_1 = arith.constant 0 : i32
    return %c0_i32, %c0_i32_0 : i32, i32
  }
  func.func @transform_4(%arg0: i32, %arg1: i32) -> (i32, i32) {
    %c0_i32 = arith.constant 0 : i32
    %c0_i32_0 = arith.constant 0 : i32
    %c0_i32_1 = arith.constant 0 : i32
    return %c0_i32, %c0_i32_0 : i32, i32
  }
  func.func @transform_5(%arg0: i32, %arg1: i32) -> (i32, i32) {
    %c0_i32 = arith.constant 0 : i32
    %c0_i32_0 = arith.constant 0 : i32
    %c0_i32_1 = arith.constant 0 : i32
    return %c0_i32, %c0_i32_0 : i32, i32
  }
  func.func @transform_6(%arg0: i32, %arg1: i32) -> (i32, i32) {
    %c0_i32 = arith.constant 0 : i32
    %c0_i32_0 = arith.constant 0 : i32
    %c0_i32_1 = arith.constant 0 : i32
    return %c0_i32, %c0_i32_0 : i32, i32
  }
  func.func @transform_7(%arg0: i32, %arg1: i32) -> (i32, i32) {
    %c0_i32 = arith.constant 0 : i32
    %c0_i32_0 = arith.constant 0 : i32
    %c0_i32_1 = arith.constant 0 : i32
    return %c0_i32, %c0_i32_0 : i32, i32
  }
  func.func @transform_8(%arg0: i32, %arg1: i32) -> (i32, i32) {
    %c0_i32 = arith.constant 0 : i32
    %c0_i32_0 = arith.constant 0 : i32
    %c0_i32_1 = arith.constant 0 : i32
    return %c0_i32, %c0_i32_0 : i32, i32
  }
  func.func @transform_9(%arg0: i32, %arg1: i32) -> (i32, i32) {
    %c0_i32 = arith.constant 0 : i32
    %c0_i32_0 = arith.constant 0 : i32
    %c0_i32_1 = arith.constant 0 : i32
    return %c0_i32, %c0_i32_0 : i32, i32
  }
  func.func @transform_10(%arg0: i32, %arg1: i32) -> (i32, i32, i32, i32) {
    %c0_i32 = arith.constant 0 : i32
    %c0_i32_0 = arith.constant 0 : i32
    %c0_i32_1 = arith.constant 0 : i32
    return %arg0, %arg1, %c0_i32, %c0_i32_0 : i32, i32, i32, i32
  }
}

</mosaic_0001>

<bundles_post_ra>
// kernel: tpu_custom_call.1
= control target key start
LH: loop header
LB: loop body
LE: loop exit
PB: predicated region body
PF: predicated region fallthrough
CT: control target
= control target key end

     0   :  { %s2715_s0 = inlined_call_operand.vmem [shape: f32[2,128,32], index: 0, kind: input, shape index: {}]   ;;  %s2716_s1 = inlined_call_operand.vmem [shape: f32[2,1,128], index: 1, kind: input, shape index: {}]   ;;  %s2717_s2 = inlined_call_operand.vmem [shape: f32[2,8,1], index: 2, kind: input, shape index: {}]   ;;  %s2718_s3 = inlined_call_operand.vmem [shape: f32[32,32], index: 3, kind: input, shape index: {}]   ;;  %s2719_s4 = inlined_call_operand.vmem [shape: f32[1,32], index: 4, kind: input, shape index: {}]   ;;  %s2720_s5 = inlined_call_operand.vmem [shape: f32[32,4], index: 5, kind: input, shape index: {}]   ;;  %s2721_s6 = inlined_call_operand.vmem [shape: f32[1,4], index: 6, kind: input, shape index: {}]   ;;  %s2722_s7 = inlined_call_operand.vmem [shape: f32[128,8], index: 7, kind: input, shape index: {}]   ;;  %s2723_s8 = inlined_call_operand.vmem [shape: f32[128,8], index: 8, kind: input, shape index: {}]   ;;  %s2724_s9 = inlined_call_operand.vmem [shape: f32[8,128], index: 9, kind: input, shape index: {}]   ;;  %s2725_s10 = inlined_call_operand.hbm [shape: f32[2,2,8,128], index: 10, kind: output, shape index: {}]  }
   0x1   :  { %2730 = sst [smem:[#allocation14_spill]] %s2715_s0 }
   0x2   :  { %2731 = sst [smem:[#allocation15_spill]] %s2717_s2 }
   0x3   :  { %15 = vsyncpa [#allocation6], 0 }
   0x4   :  { %17 = vsyncpa [#allocation6 + $0x1], 0  ;;  %s1892_s13 = smov 0   ;;  %s1894_s14 = smov 0  }
   0x5   :  { %s1896_s15 = smov 0   ;;  %s1898_s16 = smov 0  }
   0x6   :  { %s1900_s17 = smov 0   ;;  %s1902_s18 = smov 0  }
   0x7 LB: > { %s1599_s19 = sadd.s32 4294967295, %s1826_s18   ;;  %s1600_s20 = sadd.s32 4294967294, %s1826_s18   ;;  %s1826_s18 = sphi %s1902_s18, %s23_s18   ;;  %s1822_s17 = sphi %s1900_s17, %s2754_s17   ;;  %s1818_s16 = sphi %s1898_s16, %s2753_s16   ;;  %s1814_s15 = sphi %s1896_s15, %s2752_s15   ;;  %s1810_s14 = sphi %s1894_s14, %s2751_s14   ;;  %s1806_s13 = sphi %s1892_s13, %s2750_s13  }
   0x8   : > { %s35_s21 = sadd.s32 1, %s1822_s17  ;;  %s269_s22 = sadd.s32 1, %s1814_s15 }
   0x9   : > { %p37_p0 = scmp.ge.s32.totalorder %s35_s21, 2  ;;  %p279_p1 = scmp.ne.s32.totalorder %s1814_s15, %s1810_s14 }
   0xa   : > { %p280_p2 = scmp.eq.s32.totalorder %s1599_s19, 1  ;;  %p285_p3 = scmp.ne.s32.totalorder %s1810_s14, %s1806_s13 }
   0xb   : > { %s2756_s21 = smov (%p37_p0, %s35_s21), 0  ;;  %p286_p5 = scmp.eq.s32.totalorder %s1600_s20, 1 }
   0xc   : > { %p1932_p4 = por %p280_p2, %p279_p1  ;;  %s264_s24 = ssub.s32 %s1822_s17, %s2756_s21 }
   0xd   : > { %p1603_p6 = scmp.ge.s32.totalorder %s1826_s18, 1  ;;  %p267_p7 = scmp.eq.s32.totalorder %s264_s24, 0 }
   0xe   : > { %p1939_p8 = por %p286_p5, %p285_p3  ;;  %p346_p9 = scmp.lt.s32.totalorder %s1826_s18, 3 }
   0xf   : > { %s1945_s26 = scalar_select %p267_p7, %s1814_s15, %s269_s22  }
  0x10   : > { %p347_p10 = pnand %p1603_p6, %p346_p9 }
  0x12   : > { %350 = sbr.rel (%p347_p10) target bundleno = 1000 (0x3e8), region = 60 }
  0x17   : > { %v1950_v0 = vld [vmem:[%s2723_s8] sm:$0xff]  ;;  %v427_v2 = vld [vmem:[%s2718_s3 + $0x18] sm:$0xff]  ;;  %p391_p11 = scmp.lt.s32.totalorder %s1818_s16, 1  ;;  %s2726_s19 = smov 8   ;;  %v426_v3 = vld [vmem:[%s2718_s3 + $0x10] sm:$0xff]  ;;  %vm432_vm0 = vcmask 261120  }
  0x18   : > { %v1955_v1 = vld [vmem:[%s2722_s7] sm:$0xff]  ;;  %756 = vrot.lane.b32.xlu1 %v1950_v0, %s2726_s19  ;;  %493 = vmatpush.msra.mxu0 %v427_v2  ;;  %v425_v4 = vld [vmem:[%s2718_s3 + $0x8] sm:$0xff]  ;;  %s2734_s0 = sld [smem:[#allocation14_spill]]  ;;  %v2003_v12 = vld [vmem:[%s2722_s7 + $0x18] sm:$0xff]  ;;  %s1830_s12 = smov 24   ;;  %vm776_vm1 = vcmask 64512  }
  0x19   : > { %766 = vrot.lane.b32.xlu2 %v1955_v1, %s2726_s19  ;;  %1665 = vmatpush.msra.mxu2 %v427_v2  ;;  %s1969_s24 = scalar_select %p391_p11, %s1818_s16, 1  ;;  %v424_v5 = vld [vmem:[%s2718_s3] sm:$0xff]  ;;  %v1988_v8 = vld [vmem:[%s2722_s7 + $0x8] sm:$0xff]  ;;  %v2008_v13 = vld [vmem:[%s2722_s7 + $0x10] sm:$0xff]  ;;  %vm720_vm2 = vcmask 15360   ;;  %vm1368_vm3 = vcmask 130048  }
  0x1a   : > { %1666 = vmatpush.msra.mxu3 %v427_v2  ;;  %494 = vmatpush.msra.mxu0 %v426_v3  ;;  %v2021_v16 = vld [vmem:[%s2722_s7 + $0x28] sm:$0xff]  ;;  %v2026_v17 = vld [vmem:[%s2722_s7 + $0x20] sm:$0xff]  ;;  %v2039_v20 = vld [vmem:[%s2722_s7 + $0x38] sm:$0xff]  ;;  %s2738_s19 = smov 16   ;;  %s2741_s27 = smov 8  }
  0x1b   : > { %1667 = vmatpush.msra.mxu2 %v426_v3  ;;  %s1663_s29 = sshll.u32 %s1969_s24, 7  ;;  %v2044_v21 = vld [vmem:[%s2722_s7 + $0x30] sm:$0xff]  ;;  %v2057_v24 = vld [vmem:[%s2722_s7 + $0x48] sm:$0xff]  ;;  %v2062_v25 = vld [vmem:[%s2722_s7 + $0x40] sm:$0xff]  ;;  %s1833_s11 = smov 112  }
  0x1c   : > { %1668 = vmatpush.msra.mxu3 %v426_v3  ;;  %495 = vmatpush.msra.mxu0 %v425_v4  ;;  %v753_v26 = vld [vmem:[%s2723_s8 + $0x78] sm:$0xff]  ;;  %v2084_v30 = vld [vmem:[%s2722_s7 + $0x50] sm:$0xff]  ;;  %v2096_v32 = vld [vmem:[%s2722_s7 + $0x68] sm:$0xff]  ;;  %s398_s20 = scalar_lea.vmem %s2716_s1, %s1969_s24  ;;  %s1607_s28 = sshll.u32 %s1969_s24, 3 }
  0x1d   : > { %1669 = vmatpush.msra.mxu2 %v425_v4  ;;  %v2079_v29 = vld [vmem:[%s2722_s7 + $0x58] sm:$0xff]  ;;  %v2101_v33 = vld [vmem:[%s2722_s7 + $0x60] sm:$0xff]  ;;  %v2117_v36 = vld [vmem:[%s2722_s7 + $0x70] sm:$0xff]  ;;  %s2749_s2 = sld [smem:[#allocation15_spill]] }
  0x1e   : > { %s1981_s22 = scalar_lea.vmem %s2734_s0, %s1663_s29  ;;  %1670 = vmatpush.msra.mxu3 %v425_v4  ;;  %496 = vmatpush.msra.mxu0 %v424_v5  ;;  %s2728_s29 = smov 16   ;;  %v2112_v35 = vld [vmem:[%s2722_s7 + $0x78] sm:$0xff]  ;;  %v2128_v38 = vld [vmem:[%s2723_s8 + $0x8] sm:$0xff]  ;;  %v2143_v40 = vld [vmem:[%s2723_s8 + $0x10] sm:$0xff] }
  0x1f   : > { %v408_v6 = vld [vmem:[%s1981_s22] sm:$0xff]  ;;  %v417_v7 = vld [vmem:[%s1981_s22 + $0x48] sm:$0xff]  ;;  %1671 = vmatpush.msra.mxu2 %v424_v5  ;;  %v423_v9 = vld [vmem:[%s1981_s22 + $0x78] sm:$0xff]  ;;  %1110 = vrot.lane.b32.xlu0 %v753_v26, %s2728_s29 }
  0x20   : > { %1608 = vmatmul.msk.f32.vlgmr.msra.gmra.mxu0 %vm432_vm0, %v408_v6  ;;  %1617 = vmatmul.msk.f32.vlgmr.msra.gmra.mxu2 %vm432_vm0, %v417_v7  ;;  %v409_v10 = vld [vmem:[%s1981_s22 + $0x8] sm:$0xff]  ;;  %v418_v11 = vld [vmem:[%s1981_s22 + $0x50] sm:$0xff]  ;;  %v419_v15 = vld [vmem:[%s1981_s22 + $0x58] sm:$0xff] }
  0x21   : > { %795 = vrot.lane.b32.xlu1 %v1988_v8, %s2728_s29  ;;  %793 = vrot.lane.b32.xlu2 %v1955_v1, %s2728_s29  ;;  %v410_v14 = vld [vmem:[%s1981_s22 + $0x10] sm:$0xff]  ;;  %v411_v18 = vld [vmem:[%s1981_s22 + $0x18] sm:$0xff] }
  0x22   : > { %1672 = vmatpush.msra.mxu3 %v424_v5  ;;  %v420_v19 = vld [vmem:[%s1981_s22 + $0x60] sm:$0xff]  ;;  %v421_v23 = vld [vmem:[%s1981_s22 + $0x68] sm:$0xff]  ;;  %v422_v28 = vld [vmem:[%s1981_s22 + $0x70] sm:$0xff] }
  0x23   : > { %1623 = vmatmul.msk.f32.vlgmr.msra.gmra.mxu3 %vm432_vm0, %v423_v9  ;;  %v412_v22 = vld [vmem:[%s1981_s22 + $0x20] sm:$0xff]  ;;  %v413_v27 = vld [vmem:[%s1981_s22 + $0x28] sm:$0xff]  ;;  %v414_v31 = vld [vmem:[%s1981_s22 + $0x30] sm:$0xff] }
  0x24   : > { %v415_v34 = vld [vmem:[%s1981_s22 + $0x38] sm:$0xff]  ;;  %v416_v37 = vld [vmem:[%s1981_s22 + $0x40] sm:$0xff]  ;;  %v2152_v41 = vld [vmem:[%s2723_s8 + $0x28] sm:$0xff]  ;;  %s1831_s22 = smov 120  }
  0x25   : > { %v2138_v39 = vld [vmem:[%s2723_s8 + $0x18] sm:$0xff]  ;;  %v2157_v42 = vld [vmem:[%s2723_s8 + $0x20] sm:$0xff]  ;;  %v2176_v46 = vld [vmem:[%s2723_s8 + $0x30] sm:$0xff] }
  0x26   : > { %v549_v44 = vld [vmem:[%s2720_s5 + $0x18] sm:$0xff]  ;;  %v548_v47 = vld [vmem:[%s2720_s5 + $0x10] sm:$0xff]  ;;  %v547_v49 = vld [vmem:[%s2720_s5 + $0x8] sm:$0xff] }
  0x27   : > { %614 = vmatpush.msra.mxu1 %v549_v44  ;;  %1673 = vmatpush.msrb.mxu3 %v549_v44  ;;  %v2171_v45 = vld [vmem:[%s2723_s8 + $0x38] sm:$0xff]  ;;  %v2193_v50 = vld [vmem:[%s2723_s8 + $0x48] sm:$0xff]  ;;  %v2198_v51 = vld [vmem:[%s2723_s8 + $0x40] sm:$0xff] }
  0x28   : > { %1609 = vmatmul.msk.f32.gmra.mxu0 %vm432_vm0, %v409_v10  ;;  %1618 = vmatmul.msk.f32.gmra.mxu2 %vm432_vm0, %v418_v11  ;;  %v546_v52 = vld [vmem:[%s2720_s5] sm:$0xff]  ;;  %v752_v54 = vld [vmem:[%s2723_s8 + $0x70] sm:$0xff]  ;;  %v751_v57 = vld [vmem:[%s2723_s8 + $0x68] sm:$0xff] }
  0x29   : > { %799 = vrot.lane.b32.xlu1 %v2003_v12, %s2728_s29  ;;  %797 = vrot.lane.b32.xlu2 %v2008_v13, %s2728_s29  ;;  %v2229_v60 = vld [vmem:[%s2719_s4] ss:$0 sm:$0xff] }
  0x2a   : > { %615 = vmatpush.msra.mxu1 %v548_v47  ;;  %1674 = vmatpush.msrb.mxu3 %v548_v47 }
  0x2c   : > { %616 = vmatpush.msra.mxu1 %v547_v49  ;;  %1675 = vmatpush.msrb.mxu3 %v547_v49  ;;  %v748_v49 = vld [vmem:[%s2723_s8 + $0x50] sm:$0xff] }
  0x2e   : > { %617 = vmatpush.msra.mxu1 %v546_v52  ;;  %1676 = vmatpush.msrb.mxu3 %v546_v52 }
  0x30   : > { %1610 = vmatmul.msk.f32.gmra.mxu0 %vm432_vm0, %v410_v14  ;;  %1619 = vmatmul.msk.f32.gmra.mxu2 %vm432_vm0, %v419_v15  ;;  %v750_v14 = vld [vmem:[%s2723_s8 + $0x60] sm:$0xff] }
  0x31   : > { %803 = vrot.lane.b32.xlu1 %v2021_v16, %s2728_s29  ;;  %801 = vrot.lane.b32.xlu2 %v2026_v17, %s2728_s29 }
  0x38   : > { %1611 = vmatmul.msk.f32.gmra.mxu0 %vm432_vm0, %v411_v18  ;;  %1620 = vmatmul.msk.f32.gmra.mxu2 %vm432_vm0, %v420_v19 }
  0x39   : > { %807 = vrot.lane.b32.xlu1 %v2039_v20, %s2728_s29  ;;  %805 = vrot.lane.b32.xlu2 %v2044_v21, %s2728_s29 }
  0x40   : > { %1612 = vmatmul.msk.f32.gmra.mxu0 %vm432_vm0, %v412_v22  ;;  %1621 = vmatmul.msk.f32.gmra.mxu2 %vm432_vm0, %v421_v23 }
  0x41   : > { %811 = vrot.lane.b32.xlu1 %v2057_v24, %s2728_s29  ;;  %809 = vrot.lane.b32.xlu2 %v2062_v25, %s2728_s29 }
  0x48   : > { %1613 = vmatmul.msk.f32.gmra.mxu0 %vm432_vm0, %v413_v27  ;;  %1622 = vmatmul.msk.f32.gmra.mxu2 %vm432_vm0, %v422_v28  ;;  %v749_v27 = vld [vmem:[%s2723_s8 + $0x58] sm:$0xff] }
  0x49   : > { %815 = vrot.lane.b32.xlu1 %v2079_v29, %s2728_s29  ;;  %813 = vrot.lane.b32.xlu2 %v2084_v30, %s2728_s29 }
  0x50   : > { %1614 = vmatmul.msk.f32.gmra.mxu0 %vm432_vm0, %v414_v31 }
  0x51   : > { %819 = vrot.lane.b32.xlu1 %v2096_v32, %s2728_s29  ;;  %817 = vrot.lane.b32.xlu2 %v2101_v33, %s2728_s29 }
  0x58   : > { %1615 = vmatmul.msk.f32.gmra.mxu0 %vm432_vm0, %v415_v34 }
  0x59   : > { %823 = vrot.lane.b32.xlu1 %v2112_v35, %s2728_s29  ;;  %821 = vrot.lane.b32.xlu2 %v2117_v36, %s2728_s29 }
  0x60   : > { %1616 = vmatmul.msk.f32.gmra.mxu0 %vm432_vm0, %v416_v37 }
  0x61   : > { %874 = vrot.lane.b32.xlu1 %v2128_v38, %s1830_s12  ;;  %872 = vrot.lane.b32.xlu2 %v1950_v0, %s1830_s12 }
  0x69   : > { %878 = vrot.lane.b32.xlu1 %v2138_v39, %s1830_s12  ;;  %876 = vrot.lane.b32.xlu2 %v2143_v40, %s1830_s12 }
  0x71   : > { %882 = vrot.lane.b32.xlu1 %v2152_v41, %s1830_s12  ;;  %880 = vrot.lane.b32.xlu2 %v2157_v42, %s1830_s12 }
  0x73   : > { %v2163_v43 = vpop.permute.xlu2 %766 }
  0x79   : > { %886 = vrot.lane.b32.xlu1 %v2171_v45, %s1830_s12  ;;  %884 = vrot.lane.b32.xlu2 %v2176_v46, %s1830_s12 }
  0x7b   : > { %v2185_v48 = vpop.permute.xlu2 %793 }
  0x7c   : > { %2735 = vst [vmem:[#allocation8_spill] sm:$0xff] %v2185_v48 }
  0x81   : > { %890 = vrot.lane.b32.xlu1 %v2193_v50, %s1830_s12  ;;  %888 = vrot.lane.b32.xlu2 %v2198_v51, %s1830_s12 }
  0x83   : > { %v2207_v53 = vpop.permute.xlu2 %797 }
  0x84   : > { %2736 = vst [vmem:[#allocation9_spill] sm:$0xff] %v2207_v53 }
  0x89   : > { %900 = vrot.lane.b32.xlu1 %v752_v54, %s1830_s12  ;;  %902 = vrot.lane.b32.xlu2 %v753_v26, %s1830_s12 }
  0x8a   : > { %v757_v55 = vpop.permute.xlu1 %756 }
  0x8b   : > { %v2214_v56 = vpop.permute.xlu2 %801 }
  0x8c   : > { %2737 = vst [vmem:[#allocation10_spill] sm:$0xff] %v2214_v56 }
  0x91   : > { %898 = vrot.lane.b32.xlu1 %v751_v57, %s1830_s12  ;;  %1108 = vrot.lane.b32.xlu2 %v752_v54, %s2738_s19 }
  0x93   : > { %v2221_v58 = vpop.permute.xlu1 %795  ;;  %v2223_v59 = vpop.permute.xlu2 %805 }
  0x94   : > { %2739 = vst [vmem:[#allocation11_spill] sm:$0xff] %v2221_v58 }
  0x99   : > { %1106 = vrot.lane.b32.xlu2 %v751_v57, %s2738_s19 }
  0x9b   : > { %v2231_v61 = vpop.permute.xlu1 %799  ;;  %v2233_v62 = vpop.permute.xlu2 %809 }
  0x9c   : > { %2740 = vst [vmem:[#allocation12_spill] sm:$0xff] %v2231_v61 }
  0x9d   : > { %v498_v63 = vpop.f32.mrf.mxu0 }
  0x9e   : > { %v2236_v2 = vadd.f32 %v2229_v60, %v498_v63 }
  0xa0   : > { %1624 = vmatmul.msk.f32.vlgmr.msra.gmra.mxu1 %vm432_vm0, %v2236_v2  ;;  %v770_v3 = vmul.f32 %v1950_v0, %v2236_v2  ;;  %v759_v4 = vmul.f32 %v757_v55, %v2236_v2 }
  0xa2   : > { %772 = vrot.lane.b32.xlu1 %v770_v3, %s2741_s27  ;;  %761 = vrot.lane.b32.xlu2 %v759_v4, %s1831_s22 }
  0xa3   : > { %v2245_v5 = vpop.permute.xlu1 %803  ;;  %v2247_v6 = vpop.permute.xlu2 %813 }
  0xa4   : > { %2742 = vst [vmem:[#allocation13_spill] sm:$0xff] %v2245_v5  ;;  %v525_v7 = vpop.f32.mrf.mxu2 }
  0xa5   : > { %v2250_v9 = vadd.f32 %v2229_v60, %v525_v7  ;;  %v501_v10 = vpop.f32.mrf.mxu0 }
  0xa6   : > { %v2253_v11 = vadd.f32 %v2229_v60, %v501_v10 }
  0xa7   : > { %1633 = vmatmul.msk.f32.vlgmr.msrb.gmra.mxu3 %vm432_vm0, %v2250_v9 }
  0xa8   : > { %1625 = vmatmul.msk.f32.gmra.mxu1 %vm432_vm0, %v2253_v11 }
  0xaa   : > { %896 = vrot.lane.b32.xlu1 %v750_v14, %s1830_s12  ;;  %1104 = vrot.lane.b32.xlu2 %v750_v14, %s2738_s19 }
  0xab   : > { %v2264_v15 = vpop.permute.xlu1 %807  ;;  %v2266_v18 = vpop.permute.xlu2 %817 }
  0xac   : > { %v528_v19 = vpop.f32.mrf.mxu2 }
  0xad   : > { %v2269_v22 = vadd.f32 %v2229_v60, %v528_v19  ;;  %v504_v23 = vpop.f32.mrf.mxu0 }
  0xae   : > { %v2272_v26 = vadd.f32 %v2229_v60, %v504_v23 }
  0xaf   : > { %1634 = vmatmul.msk.f32.gmra.mxu3 %vm432_vm0, %v2269_v22 }
  0xb0   : > { %1626 = vmatmul.msk.f32.gmra.mxu1 %vm432_vm0, %v2272_v26 }
  0xb2   : > { %894 = vrot.lane.b32.xlu1 %v749_v27, %s1830_s12  ;;  %1102 = vrot.lane.b32.xlu2 %v749_v27, %s2738_s19 }
  0xb3   : > { %v2283_v28 = vpop.permute.xlu1 %811  ;;  %v2285_v31 = vpop.permute.xlu2 %821 }
  0xb4   : > { %v531_v34 = vpop.f32.mrf.mxu2 }
  0xb5   : > { %v2288_v37 = vadd.f32 %v2229_v60, %v531_v34  ;;  %v507_v44 = vpop.f32.mrf.mxu0 }
  0xb6   : > { %v2291_v47 = vadd.f32 %v2229_v60, %v507_v44 }
  0xb7   : > { %1635 = vmatmul.msk.f32.gmra.mxu3 %vm432_vm0, %v2288_v37 }
  0xb8   : > { %1627 = vmatmul.msk.f32.gmra.mxu1 %vm432_vm0, %v2291_v47 }
  0xba   : > { %892 = vrot.lane.b32.xlu1 %v748_v49, %s1830_s12  ;;  %1100 = vrot.lane.b32.xlu2 %v748_v49, %s2738_s19 }
  0xbb   : > { %v2302_v52 = vpop.permute.xlu1 %815  ;;  %v2304_v54 = vpop.permute.xlu2 %872 }
  0xbc   : > { %v534_v55 = vpop.f32.mrf.mxu2 }
  0xbd   : > { %v2307_v57 = vadd.f32 %v2229_v60, %v534_v55  ;;  %v510_v63 = vpop.f32.mrf.mxu0 }
  0xbe   : > { %v2310_v3 = vadd.f32 %v2229_v60, %v510_v63 }
  0xbf   : > { %1636 = vmatmul.msk.f32.gmra.mxu3 %vm432_vm0, %v2307_v57 }
  0xc0   : > { %1628 = vmatmul.msk.f32.gmra.mxu1 %vm432_vm0, %v2310_v3 }
  0xc2   : > { %1098 = vrot.lane.b32.xlu1 %v2193_v50, %s2738_s19  ;;  %1096 = vrot.lane.b32.xlu2 %v2198_v51, %s2738_s19 }
  0xc3   : > { %v2320_v4 = vpop.permute.xlu1 %819  ;;  %v2322_v7 = vpop.permute.xlu2 %876 }
  0xc4   : > { %v537_v10 = vpop.f32.mrf.mxu2 }
  0xc5   : > { %v2325_v14 = vadd.f32 %v2229_v60, %v537_v10  ;;  %v513_v19 = vpop.f32.mrf.mxu0 }
  0xc6   : > { %v2328_v23 = vadd.f32 %v2229_v60, %v513_v19 }
  0xc7   : > { %1637 = vmatmul.msk.f32.gmra.mxu3 %vm432_vm0, %v2325_v14 }
  0xc8   : > { %1629 = vmatmul.msk.f32.gmra.mxu1 %vm432_vm0, %v2328_v23 }
  0xca   : > { %1094 = vrot.lane.b32.xlu1 %v2171_v45, %s2738_s19  ;;  %1092 = vrot.lane.b32.xlu2 %v2176_v46, %s2738_s19  ;;  %v543_v45 = vpop.f32.mrf.mxu3  ;;  %v1111_v46 = vpop.permute.xlu0 %1110 }
  0xcb   : > { %v2338_v50 = vpop.permute.xlu1 %823  ;;  %v2340_v51 = vpop.permute.xlu2 %880  ;;  %v2361_v10 = vadd.f32 %v2229_v60, %v543_v45 }
  0xcc   : > { %v540_v27 = vpop.f32.mrf.mxu2 }
  0xcd   : > { %v2343_v34 = vadd.f32 %v2229_v60, %v540_v27  ;;  %v516_v44 = vpop.f32.mrf.mxu0 }
  0xce   : > { %v2346_v49 = vadd.f32 %v2229_v60, %v516_v44  ;;  %v1143_v44 = vmul.f32 %v1111_v46, %v2361_v10 }
  0xcf   : > { %1638 = vmatmul.msk.f32.gmra.mxu3 %vm432_vm0, %v2343_v34 }
  0xd0   : > { %1630 = vmatmul.msk.f32.gmra.mxu1 %vm432_vm0, %v2346_v49 }
  0xd2   : > { %1046 = vrot.lane.b32.xlu1 %v2112_v35, %s1830_s12  ;;  %1090 = vrot.lane.b32.xlu2 %v2152_v41, %s2738_s19 }
  0xd3   : > { %v2356_v55 = vpop.permute.xlu1 %874  ;;  %v2358_v63 = vpop.permute.xlu2 %884 }
  0xd5   : > { %v519_v19 = vpop.f32.mrf.mxu0 }
  0xd6   : > { %v2364_v27 = vadd.f32 %v2229_v60, %v519_v19 }
  0xd7   : > { %1639 = vmatmul.msk.f32.gmra.mxu3 %vm432_vm0, %v2361_v10 }
  0xd8   : > { %1631 = vmatmul.msk.f32.gmra.mxu1 %vm432_vm0, %v2364_v27 }
  0xda   : > { %1190 = vrot.lane.b32.xlu2 %v1143_v44, %s2741_s27 }
  0xdb   : > { %v2372_v35 = vpop.permute.xlu1 %878  ;;  %v2374_v41 = vpop.permute.xlu2 %888 }
  0xdd   : > { %v522_v45 = vpop.f32.mrf.mxu0 }
  0xde   : > { %v2377_v53 = vadd.f32 %v2229_v60, %v522_v45 }
  0xe0   : > { %1632 = vmatmul.msk.f32.gmra.mxu1 %vm432_vm0, %v2377_v53 }
  0xe2   : > { %1088 = vrot.lane.b32.xlu2 %v2157_v42, %s2738_s19 }
  0xe3   : > { %v2383_v46 = vpop.permute.xlu1 %882  ;;  %v903_v19 = vpop.permute.xlu2 %902 }
  0xe4   : > { %v935_v5 = vmul.f32 %v903_v19, %v2361_v10 }
  0xe6   : > { %982 = vrot.lane.b32.xlu1 %v935_v5, %s1831_s22 }
  0xeb   : > { %v2387_v44 = vpop.permute.xlu1 %886  ;;  %v1109_v48 = vpop.permute.xlu2 %1108 }
  0xec   : > { %v1142_v58 = vmul.f32 %v1109_v48, %v2343_v34 }
  0xee   : > { %1044 = vrot.lane.b32.xlu1 %v2117_v36, %s1830_s12  ;;  %1188 = vrot.lane.b32.xlu2 %v1142_v58, %s2741_s27 }
  0xf3   : > { %v891_v60 = vpop.permute.xlu1 %890  ;;  %v1107_v45 = vpop.permute.xlu2 %1106 }
  0xf4   : > { %v1141_v19 = vmul.f32 %v1107_v45, %v2325_v14  ;;  %v754_v45 = vmul.f32 %v1955_v1, %v2236_v2 }
  0xf6   : > { %1086 = vrot.lane.b32.xlu2 %v2138_v39, %s2738_s19 }
  0xfb   : > { %v901_v42 = vpop.permute.xlu1 %900 }
  0xfc   : > { %v934_v5 = vmul.f32 %v901_v42, %v2343_v34  ;;  %v762_v61 = vpop.permute.xlu2 %761  ;;  %v769_v42 = vmul.f32 %v2163_v43, %v2236_v2 }
  0xfe   : > { %980 = vrot.lane.b32.xlu1 %v934_v5, %s1831_s22  ;;  %1186 = vrot.lane.b32.xlu2 %v1141_v19, %s2741_s27 }
 0x103   : > { %v899_v48 = vpop.permute.xlu1 %898 }
 0x104   : > { %v1105_v36 = vpop.permute.xlu2 %1104  ;;  %v933_v39 = vmul.f32 %v899_v48, %v2325_v14 }
 0x105   : > { %v1140_v48 = vmul.f32 %v1105_v36, %v2307_v57 }
 0x106   : > { %1042 = vrot.lane.b32.xlu1 %v2096_v32, %s1830_s12  ;;  %1084 = vrot.lane.b32.xlu2 %v2143_v40, %s2738_s19  ;;  %v764_v40 = vsub.f32 %v754_v45, %v762_v61 }
 0x10c   : > { %v1103_v58 = vpop.permute.xlu2 %1102 }
 0x10d   : > { %v1139_v32 = vmul.f32 %v1103_v58, %v2288_v37 }
 0x10e   : > { %978 = vrot.lane.b32.xlu1 %v933_v39, %s1831_s22  ;;  %1038 = vrot.lane.b32.xlu2 %v2079_v29, %s1830_s12 }
 0x114   : > { %v773_v19 = vpop.permute.xlu1 %772  ;;  %v1101_v39 = vpop.permute.xlu2 %1100 }
 0x115   : > { %v775_v5 = vadd.f32 %v773_v19, %v769_v42  ;;  %v1138_v42 = vmul.f32 %v1101_v39, %v2269_v22  ;;  %v928_v39 = vmul.f32 %v2374_v41, %v2377_v53 }
 0x116   : > { %1040 = vrot.lane.b32.xlu1 %v2101_v33, %s1830_s12  ;;  %1182 = vrot.lane.b32.xlu2 %v1139_v32, %s2741_s27  ;;  %v929_v32 = vmul.f32 %v891_v60, %v2250_v9 }
 0x117   : > { %v2416_v29 = vsel %vm776_vm1, %v764_v40, %v775_v5 }
 0x11c   : > { %v897_v56 = vpop.permute.xlu1 %896  ;;  %v1097_v45 = vpop.permute.xlu2 %1096 }
 0x11d   : > { %v932_v43 = vmul.f32 %v897_v56, %v2307_v57  ;;  %v619_v19 = vpop.f32.mrf.mxu1 }
 0x11e   : > { %1184 = vrot.lane.b32.xlu1 %v1140_v48, %s2741_s27 }
 0x11f   : > { %976 = vrot.lane.b32.xlu0 %v932_v43, %s1831_s22  ;;  %v927_v43 = vmul.f32 %v2387_v44, %v2364_v27 }
 0x124   : > { %v895_v61 = vpop.permute.xlu1 %894  ;;  %v1093_v56 = vpop.permute.xlu2 %1092 }
 0x125   : > { %v931_v58 = vmul.f32 %v895_v61, %v2288_v37  ;;  %v1134_v44 = vmul.f32 %v1093_v56, %v2346_v49 }
 0x127   : > { %1082 = vrot.lane.b32.xlu0 %v2128_v38, %s2738_s19  ;;  %974 = vrot.lane.b32.xlu1 %v931_v58, %s1831_s22  ;;  %v2436_v38 = vld [vmem:[%s2721_s6] ss:$0 sm:$0xff]  ;;  %v926_v58 = vmul.f32 %v2358_v63, %v2346_v49 }
 0x12c   : > { %v893_v33 = vpop.permute.xlu1 %892 }
 0x12d   : > { %v930_v36 = vmul.f32 %v893_v33, %v2269_v22 }
 0x12f   : > { %1036 = vrot.lane.b32.xlu0 %v2084_v30, %s1830_s12  ;;  %1080 = vrot.lane.b32.xlu1 %v1950_v0, %s2738_s19  ;;  %v620_v0 = vadd.f32 %v2436_v38, %v619_v19  ;;  %v1091_v30 = vpop.permute.xlu2 %1090  ;;  %s1832_s19 = smov 126  }
 0x130   : > { %972 = vrot.lane.b32.xlu2 %v930_v36, %s1831_s22 }
 0x131   : > { %v2444_v5 = vmul.f32 0.5, %v620_v0 }
 0x134   : > { %v1099_v40 = vpop.permute.xlu1 %1098 }
 0x135   : > { %v1137_v48 = vmul.f32 %v1099_v40, %v2250_v9 }
 0x137   : > { %1034 = vrot.lane.b32.xlu1 %v2057_v24, %s1830_s12  ;;  %1180 = vrot.lane.b32.xlu0 %v1138_v42, %s2741_s27  ;;  %v1136_v24 = vmul.f32 %v1097_v45, %v2377_v53  ;;  %v1191_v60 = vpop.permute.xlu2 %1190 }
 0x138   : > { %970 = vrot.lane.b32.xlu2 %v929_v32, %s1831_s22 }
 0x13c   : > { %v1095_v41 = vpop.permute.xlu1 %1094 }
 0x13d   : > { %v1135_v61 = vmul.f32 %v1095_v41, %v2364_v27 }
 0x13f   : > { %1178 = vrot.lane.b32.xlu0 %v1137_v48, %s2741_s27  ;;  %717 = vrot.lane.b32.xlu1 %v2444_v5, %s1832_s19  ;;  %v1089_v33 = vpop.permute.xlu2 %1088  ;;  %s402_s19 = scalar_lea.vmem %s2749_s2, %s1607_s28 }
 0x140   : > { %968 = vrot.lane.b32.xlu2 %v928_v39, %s1831_s22  ;;  %v1132_v19 = vmul.f32 %v1089_v33, %v2310_v3  ;;  %v922_v33 = vmul.f32 %v2322_v7, %v2272_v26  ;;  %v852_v7 = vmul.f32 %v2302_v52, %v2288_v37  ;;  %v920_v52 = vmul.f32 %v2304_v54, %v2236_v2 }
 0x144   : > { %v1047_v45 = vpop.permute.xlu1 %1046 }
 0x145   : > { %v1079_v63 = vmul.f32 %v1047_v45, %v2361_v10  ;;  %v853_v45 = vmul.f32 %v2266_v18, %v2307_v57  ;;  %v921_v18 = vmul.f32 %v2356_v55, %v2253_v11  ;;  %v851_v55 = vmul.f32 %v2247_v6, %v2269_v22 }
 0x147   : > { %1176 = vrot.lane.b32.xlu0 %v1136_v24, %s2741_s27  ;;  %1032 = vrot.lane.b32.xlu1 %v2062_v25, %s1830_s12  ;;  %v925_v25 = vmul.f32 %v2383_v46, %v2328_v23  ;;  %v1223_v42 = vadd.f32 %v1191_v60, %v1079_v63 }
 0x148   : > { %966 = vrot.lane.b32.xlu2 %v927_v43, %s1831_s22  ;;  %v1189_v36 = vpop.permute.xlu2 %1188 }
 0x14f   : > { %1174 = vrot.lane.b32.xlu0 %v1135_v61, %s2741_s27  ;;  %1030 = vrot.lane.b32.xlu1 %v2039_v20, %s1830_s12  ;;  %v1133_v20 = vmul.f32 %v1091_v30, %v2328_v23 }
 0x150   : > { %964 = vrot.lane.b32.xlu2 %v926_v58, %s1831_s22  ;;  %v1087_v46 = vpop.permute.xlu2 %1086 }
 0x157   : > { %1172 = vrot.lane.b32.xlu0 %v1134_v44, %s2741_s27  ;;  %1028 = vrot.lane.b32.xlu1 %v2044_v21, %s1830_s12  ;;  %v856_v21 = vmul.f32 %v2338_v50, %v2361_v10  ;;  %v855_v50 = vmul.f32 %v2285_v31, %v2343_v34  ;;  %v1131_v31 = vmul.f32 %v1087_v46, %v2291_v47 }
 0x158   : > { %962 = vrot.lane.b32.xlu2 %v925_v25, %s1831_s22  ;;  %v983_v32 = vpop.permute.xlu1 %982  ;;  %v1187_v30 = vpop.permute.xlu2 %1186 }
 0x159   : > { %v1015_v56 = vsub.f32 %v856_v21, %v983_v32 }
 0x15f   : > { %1170 = vrot.lane.b32.xlu0 %v1133_v20, %s2741_s27  ;;  %1026 = vrot.lane.b32.xlu1 %v2021_v16, %s1830_s12  ;;  %v924_v16 = vmul.f32 %v2340_v51, %v2310_v3  ;;  %v923_v51 = vmul.f32 %v2372_v35, %v2291_v47 }
 0x160   : > { %1334 = vrot.lane.b32.xlu2 %v1223_v42, %s1833_s11  ;;  %v1045_v0 = vpop.permute.xlu1 %1044  ;;  %v1085_v48 = vpop.permute.xlu2 %1084 }
 0x161   : > { %v1130_v44 = vmul.f32 %v1085_v48, %v2272_v26 }
 0x167   : > { %1024 = vrot.lane.b32.xlu0 %v2026_v17, %s1830_s12  ;;  %1270 = vrot.lane.b32.xlu1 %v1015_v56, %s1833_s11  ;;  %v1078_v17 = vmul.f32 %v1045_v0, %v2343_v34  ;;  %v854_v34 = vmul.f32 %v2320_v4, %v2325_v14 }
 0x168   : > { %1168 = vrot.lane.b32.xlu2 %v1132_v19, %s2741_s27  ;;  %v1039_v60 = vpop.permute.xlu2 %1038 }
 0x169   : > { %v1222_v39 = vadd.f32 %v1189_v36, %v1078_v17  ;;  %v849_v17 = vmul.f32 %v2233_v62, %v2377_v53  ;;  %v848_v62 = vmul.f32 %v2264_v15, %v2364_v27 }
 0x16f   : > { %960 = vrot.lane.b32.xlu1 %v924_v16, %s1831_s22 }
 0x170   : > { %1022 = vrot.lane.b32.xlu2 %v2003_v12, %s1830_s12  ;;  %v981_v10 = vpop.permute.xlu1 %980  ;;  %v1183_v35 = vpop.permute.xlu2 %1182 }
 0x171   : > { %v1014_v40 = vsub.f32 %v855_v50, %v981_v10 }
 0x173   : > { %1268 = vrot.lane.b32.xlu0 %v1014_v40, %s1833_s11 }
 0x177   : > { %1332 = vrot.lane.b32.xlu1 %v1222_v39, %s1833_s11 }
 0x178   : > { %v1043_v24 = vpop.permute.xlu1 %1042 }
 0x179   : > { %v1077_v12 = vmul.f32 %v1043_v24, %v2325_v14 }
 0x17b   : > { %958 = vrot.lane.b32.xlu0 %v923_v51, %s1831_s22  ;;  %v1221_v41 = vadd.f32 %v1187_v30, %v1077_v12 }
 0x17f   : > { %1166 = vrot.lane.b32.xlu1 %v1131_v31, %s2741_s27 }
 0x180   : > { %v979_v43 = vpop.permute.xlu1 %978 }
 0x181   : > { %v1013_v61 = vsub.f32 %v854_v34, %v979_v43 }
 0x183   : > { %1266 = vrot.lane.b32.xlu2 %v1013_v61, %s1833_s11  ;;  %1330 = vrot.lane.b32.xlu0 %v1221_v41, %s1833_s11  ;;  %v847_v61 = vmul.f32 %v2223_v59, %v2346_v49 }
 0x187   : > { %1020 = vrot.lane.b32.xlu1 %v2008_v13, %s1830_s12 }
 0x188   : > { %v1041_v58 = vpop.permute.xlu1 %1040 }
 0x189   : > { %v1076_v4 = vmul.f32 %v1041_v58, %v2307_v57 }
 0x18a   : > { %v973_v14 = vpop.permute.xlu2 %972 }
 0x18b   : > { %956 = vrot.lane.b32.xlu2 %v922_v33, %s1831_s22  ;;  %1164 = vrot.lane.b32.xlu0 %v1130_v44, %s2741_s27  ;;  %v1010_v50 = vsub.f32 %v851_v55, %v973_v14  ;;  %v622_v44 = vpop.f32.mrf.mxu1 }
 0x190   : > { %v1185_v25 = vpop.permute.xlu1 %1184 }
 0x191   : > { %v1220_v36 = vadd.f32 %v1185_v25, %v1076_v4  ;;  %v977_v13 = vpop.permute.xlu0 %976 }
 0x192   : > { %v1012_v63 = vsub.f32 %v853_v45, %v977_v13  ;;  %v971_v32 = vpop.permute.xlu2 %970 }
 0x193   : > { %1328 = vrot.lane.b32.xlu2 %v1220_v36, %s1833_s11  ;;  %1018 = vrot.lane.b32.xlu0 %v1988_v8, %s1830_s12  ;;  %v1075_v8 = vmul.f32 %v1039_v60, %v2288_v37  ;;  %v625_v36 = vpop.f32.mrf.mxu1 }
 0x194   : > { %1264 = vrot.lane.b32.xlu1 %v1012_v63, %s1833_s11 }
 0x195   : > { %v1219_v19 = vadd.f32 %v1183_v35, %v1075_v8 }
 0x199   : > { %v1083_v20 = vpop.permute.xlu0 %1082  ;;  %v975_v42 = vpop.permute.xlu1 %974 }
 0x19a   : > { %v1129_v46 = vmul.f32 %v1083_v20, %v2253_v11  ;;  %v1011_v21 = vsub.f32 %v852_v7, %v975_v42  ;;  %v969_v0 = vpop.permute.xlu2 %968  ;;  %v623_v20 = vadd.f32 %v2436_v38, %v622_v44  ;;  %v1834_v44 = vmov 0  }
 0x19b   : > { %v1008_v39 = vsub.f32 %v849_v17, %v969_v0  ;;  %1742 = vset.pattern.permute.xlu1 %v1834_v44 }
 0x19c   : > { %1162 = vrot.lane.b32.xlu2 %v1129_v46, %s2741_s27  ;;  %1262 = vrot.lane.b32.xlu0 %v1011_v21, %s1833_s11  ;;  %v628_v21 = vpop.f32.mrf.mxu1 }
 0x19d   : > { %954 = vrot.lane.b32.xlu1 %v921_v18, %s1831_s22  ;;  %v668_v18 = vmul.f32 0.5, %v623_v20 }
 0x1a1   : > { %v1037_v57 = vpop.permute.xlu0 %1036  ;;  %v1081_v56 = vpop.permute.xlu1 %1080 }
 0x1a2   : > { %v1074_v30 = vmul.f32 %v1037_v57, %v2269_v22  ;;  %v1128_v54 = vmul.f32 %v1081_v56, %v2236_v2  ;;  %v850_v22 = vmul.f32 %v2283_v28, %v2250_v9  ;;  %v2743_v57 = vld [vmem:[#allocation10_spill] sm:$0xff] }
 0x1a3   : > { %v845_v56 = vmul.f32 %v2743_v57, %v2310_v3 }
 0x1a4   : > { %1016 = vrot.lane.b32.xlu2 %v1955_v1, %s1830_s12  ;;  %952 = vrot.lane.b32.xlu0 %v920_v52, %s1831_s22  ;;  %v967_v1 = vpop.permute.xlu2 %966  ;;  %v1009_v51 = vsub.f32 %v850_v22, %v971_v32  ;;  %s388_s22 = sand.u32 1, %s1810_s14  }
 0x1a5   : > { %1326 = vrot.lane.b32.xlu1 %v1219_v19, %s1833_s11  ;;  %v1007_v34 = vsub.f32 %v848_v62, %v967_v1  ;;  %s1604_s30 = sshll.u32 %s388_s22, 4 }
 0x1a9   : > { %v1035_v37 = vpop.permute.xlu1 %1034  ;;  %v1181_v16 = vpop.permute.xlu0 %1180 }
 0x1aa   : > { %v1218_v10 = vadd.f32 %v1181_v16, %v1074_v30  ;;  %v1073_v6 = vmul.f32 %v1035_v37, %v2250_v9  ;;  %v631_v30 = vpop.f32.mrf.mxu1  ;;  %v629_v16 = vadd.f32 %v2436_v38, %v628_v21 }
 0x1ac   : > { %1324 = vrot.lane.b32.xlu0 %v1218_v10, %s1833_s11  ;;  %1260 = vrot.lane.b32.xlu2 %v1010_v50, %s1833_s11  ;;  %v965_v31 = vpop.permute.xlu2 %964  ;;  %v670_v1 = vmul.f32 0.5, %v629_v16 }
 0x1ad   : > { %1160 = vrot.lane.b32.xlu1 %v1128_v54, %s2741_s27  ;;  %v1006_v15 = vsub.f32 %v847_v61, %v965_v31 }
 0x1b1   : > { %v1179_v40 = vpop.permute.xlu0 %1178  ;;  %v718_v48 = vpop.permute.xlu1 %717 }
 0x1b2   : > { %v1217_v24 = vadd.f32 %v1179_v40, %v1073_v6  ;;  %721 = vst.msk [vmem:[#allocation4] sm:$0xff] %vm720_vm2, %v718_v48  ;;  %v634_v40 = vpop.f32.mrf.mxu1  ;;  %v632_v48 = vadd.f32 %v2436_v38, %v631_v30 }
 0x1b4   : > { %1322 = vrot.lane.b32.xlu2 %v1217_v24, %s1833_s11  ;;  %1256 = vrot.lane.b32.xlu0 %v1008_v39, %s1833_s11  ;;  %v2558_v58 = vpop.permute.xlu2 %962  ;;  %v671_v31 = vmul.f32 0.5, %v632_v48 }
 0x1b5   : > { %1258 = vrot.lane.b32.xlu1 %v1009_v51, %s1833_s11 }
 0x1b9   : > { %v1177_v12 = vpop.permute.xlu0 %1176  ;;  %v1033_v60 = vpop.permute.xlu1 %1032  ;;  %v1464_v48 = vld [vmem:[#allocation4] sm:$0xff] }
 0x1ba   : > { %v1072_v9 = vmul.f32 %v1033_v60, %v2377_v53 }
 0x1bc   : > { %v1216_v28 = vadd.f32 %v1177_v12, %v1072_v9  ;;  %1254 = vrot.lane.b32.xlu2 %v1007_v34, %s1833_s11  ;;  %v1335_v45 = vpop.permute.xlu2 %1334  ;;  %v635_v34 = vadd.f32 %v2436_v38, %v634_v40  ;;  %v637_v9 = vpop.f32.mrf.mxu1 }
 0x1be   : > { %1320 = vrot.lane.b32.xlu1 %v1216_v28, %s1833_s11 }
 0x1c1   : > { %v1175_v43 = vpop.permute.xlu0 %1174  ;;  %v1031_v41 = vpop.permute.xlu1 %1030 }
 0x1c2   : > { %v1071_v35 = vmul.f32 %v1031_v41, %v2364_v27 }
 0x1c4   : > { %v2560_v33 = vadd.f32 %v1175_v43, %v1071_v35  ;;  %v1169_v7 = vpop.permute.xlu2 %1168 }
 0x1c6   : > { %1252 = vrot.lane.b32.xlu1 %v1006_v15, %s1833_s11  ;;  %v638_v15 = vadd.f32 %v2436_v38, %v637_v9 }
 0x1c9   : > { %v1173_v53 = vpop.permute.xlu0 %1172  ;;  %v1029_v4 = vpop.permute.xlu1 %1028 }
 0x1ca   : > { %v1070_v14 = vmul.f32 %v1029_v4, %v2346_v49  ;;  %v673_v4 = vmul.f32 0.5, %v638_v15 }
 0x1cc   : > { %v1214_v25 = vadd.f32 %v1173_v53, %v1070_v14  ;;  %v1023_v52 = vpop.permute.xlu2 %1022  ;;  %v640_v53 = vpop.f32.mrf.mxu1 }
 0x1cd   : > { %v1067_v39 = vmul.f32 %v1023_v52, %v2291_v47 }
 0x1ce   : > { %1316 = vrot.lane.b32.xlu2 %v1214_v25, %s1833_s11 }
 0x1d1   : > { %v1171_v59 = vpop.permute.xlu0 %1170  ;;  %v1027_v13 = vpop.permute.xlu1 %1026 }
 0x1d2   : > { %v1069_v27 = vmul.f32 %v1027_v13, %v2328_v23  ;;  %v646_v13 = vpop.f32.mrf.mxu3 }
 0x1d3   : > { %v647_v16 = vadd.f32 %v2436_v38, %v646_v13 }
 0x1d4   : > { %v1213_v63 = vadd.f32 %v1171_v59, %v1069_v27  ;;  %v641_v27 = vadd.f32 %v2436_v38, %v640_v53 }
 0x1d6   : > { %683 = vxpose.xlu0.b32.start [1/16] (narrow) %v2444_v5, 8  ;;  %1314 = vrot.lane.b32.xlu1 %v1213_v63, %s1833_s11  ;;  %v626_v5 = vadd.f32 %v2436_v38, %v625_v36  ;;  %v674_v20 = vmul.f32 0.5, %v641_v27 }
 0x1d8   : > { %v669_v55 = vmul.f32 0.5, %v626_v5 }
 0x1d9   : > { %v1025_v42 = vpop.permute.xlu0 %1024  ;;  %v1271_v49 = vpop.permute.xlu1 %1270 }
 0x1da   : > { %v1068_v32 = vmul.f32 %v1025_v42, %v2310_v3  ;;  %v1367_v46 = vsel %vm776_vm1, %v1271_v49, %v1335_v45  ;;  %v2744_v3 = vld [vmem:[#allocation12_spill] sm:$0xff]  ;;  %v643_v42 = vpop.f32.mrf.mxu1  ;;  %v649_v57 = vpop.f32.mrf.mxu3 }
 0x1db   : > { %1640 = vmatpush.xpose.msk.msrb.mxu2 %vm1368_vm3, %v1367_v46  ;;  %v844_v17 = vmul.f32 %v2744_v3, %v2291_v47  ;;  %v672_v47 = vmul.f32 0.5, %v635_v34 }
 0x1dc   : > { %v2572_v8 = vadd.f32 %v1169_v7, %v1068_v32  ;;  %v1835_v7 = vmov 1   ;;  %v2745_v32 = vld [vmem:[#allocation11_spill] sm:$0xff] }
 0x1dd   : > { %v1267_v50 = vpop.permute.xlu2 %1266  ;;  %1743 = vset.pattern.permute.xlu2 %v1835_v7  ;;  %v842_v46 = vmul.f32 %v2745_v32, %v2253_v11  ;;  %v1441_v32 = vld [vmem:[%s402_s19] sm:$0xff]  ;;  %s1664_s19 = sshll.u32 %s1818_s16, 4  ;;  %s1484_s16 = scalar_lea.sflag [#allocation6], %s388_s22 }
 0x1de   : > { %684 = vxpose.xlu0.b32.cont [2/16] (narrow) %v668_v18, 8  ;;  %v644_v18 = vadd.f32 %v2436_v38, %v643_v42  ;;  %s1497_s24 = scalar_lea.hbm %s2725_s10, %s1664_s19 }
 0x1df   : > { %s1500_s12 = sshll.u32 %s1497_s24, 4  ;;  %s1501_s12 = int_to_ptr.hbm [resolvable:$true] %s1500_s12 }
 0x1e0   : > { %v675_v52 = vmul.f32 0.5, %v644_v18  ;;  %s1762_s0 = sshra.s32 %s1501_s12, 4  ;;  %s1763_s0 = int_to_ptr.hbm [resolvable:$true] %s1762_s0 }
 0x1e1   : > { %v961_v19 = vpop.permute.xlu1 %960  ;;  %s1764_s2 = scalar_lea.hbm %s1763_s0, 16  ;;  %p1769_p1 = scmp.lt.s32.totalorder %s1763_s0, %s2725_s10 }
 0x1e2   : > { %v1004_v0 = vsub.f32 %v845_v56, %v961_v19  ;;  %v2746_v19 = vld [vmem:[#allocation8_spill] sm:$0xff]  ;;  %p1765_p12 = scmp.ne.s32.totalorder %s1763_s0, %s1764_s2 }
 0x1e4   : > { %1248 = vrot.lane.b32.xlu2 %v1004_v0, %s1833_s11  ;;  %v841_v0 = vmul.f32 %v2746_v19, %v2236_v2  ;;  %p1766_p13 = pnand %p1765_p12, %p1932_p4 }
 0x1e5   : > { %v1269_v37 = vpop.permute.xlu0 %1268  ;;  %v2586_v62 = vpop.permute.xlu2 %956 }
 0x1e6   : > { %685 = vxpose.xlu0.b32.cont [3/16] (narrow) %v669_v55, 8  ;;  %p1767_p0 = pneg %p1766_p13 }
 0x1e9   : > { %v1333_v10 = vpop.permute.xlu1 %1332 }
 0x1ea   : > { %v1366_v54 = vsel %vm776_vm1, %v1269_v37, %v1333_v10  ;;  %v652_v10 = vpop.f32.mrf.mxu3 }
 0x1eb   : > { %1641 = vmatpush.xpose.msk.msrb.mxu2 %vm1368_vm3, %v1366_v54 }
 0x1ed   : > { %v959_v6 = vpop.permute.xlu0 %958  ;;  %v1329_v41 = vpop.permute.xlu2 %1328 }
 0x1ee   : > { %v1003_v22 = vsub.f32 %v844_v17, %v959_v6  ;;  %686 = vxpose.xlu0.b32.cont [4/16] (narrow) %v670_v1, 8 }
 0x1f0   : > { %1246 = vrot.lane.b32.xlu1 %v1003_v22, %s1833_s11  ;;  %v650_v22 = vadd.f32 %v2436_v38, %v649_v57 }
 0x1f1   : > { %v1167_v24 = vpop.permute.xlu1 %1166 }
 0x1f2   : > { %v1211_v51 = vadd.f32 %v1167_v24, %v1067_v39  ;;  %v677_v39 = vmul.f32 0.5, %v650_v22  ;;  %v655_v24 = vpop.f32.mrf.mxu3 }
 0x1f3   : > { %v656_v34 = vadd.f32 %v2436_v38, %v655_v24 }
 0x1f4   : > { %1310 = vrot.lane.b32.xlu2 %v1211_v51, %s1833_s11 }
 0x1f5   : > { %v1331_v12 = vpop.permute.xlu0 %1330 }
 0x1f6   : > { %687 = vxpose.xlu0.b32.cont [5/16] (narrow) %v671_v31, 8  ;;  %v1365_v60 = vsel %vm776_vm1, %v1267_v50, %v1331_v12  ;;  %v1163_v36 = vpop.permute.xlu2 %1162  ;;  %v676_v50 = vmul.f32 0.5, %v647_v16 }
 0x1f7   : > { %1642 = vmatpush.xpose.msk.msrb.mxu2 %vm1368_vm3, %v1365_v60 }
 0x1f9   : > { %v1021_v28 = vpop.permute.xlu1 %1020 }
 0x1fa   : > { %v1066_v43 = vmul.f32 %v1021_v28, %v2272_v26 }
 0x1fd   : > { %v1165_v61 = vpop.permute.xlu0 %1164 }
 0x1fe   : > { %v1210_v35 = vadd.f32 %v1165_v61, %v1066_v43  ;;  %688 = vxpose.xlu0.b32.cont [6/16] (narrow) %v672_v47, 8  ;;  %v1017_v56 = vpop.permute.xlu2 %1016  ;;  %v658_v47 = vpop.f32.mrf.mxu3 }
 0x1ff   : > { %v1064_v1 = vmul.f32 %v1017_v56, %v2236_v2  ;;  %v653_v2 = vadd.f32 %v2436_v38, %v652_v10  ;;  %v659_v61 = vadd.f32 %v2436_v38, %v658_v47 }
 0x200   : > { %1308 = vrot.lane.b32.xlu1 %v1210_v35, %s1833_s11 }
 0x201   : > { %v678_v60 = vmul.f32 0.5, %v653_v2  ;;  %v680_v15 = vmul.f32 0.5, %v659_v61 }
 0x205   : > { %v1019_v14 = vpop.permute.xlu0 %1018 }
 0x206   : > { %v1065_v25 = vmul.f32 %v1019_v14, %v2253_v11  ;;  %689 = vxpose.xlu0.b32.cont [7/16] (narrow) %v673_v4, 8  ;;  %v1265_v45 = vpop.permute.xlu1 %1264  ;;  %v1261_v54 = vpop.permute.xlu2 %1260 }
 0x207   : > { %v1364_v59 = vsel %vm776_vm1, %v1265_v45, %v1329_v41  ;;  %v679_v41 = vmul.f32 0.5, %v656_v34  ;;  %v661_v35 = vpop.f32.mrf.mxu3 }
 0x208   : > { %v2599_v63 = vadd.f32 %v1163_v36, %v1065_v25  ;;  %1643 = vmatpush.xpose.msk.msrb.mxu2 %vm1368_vm3, %v1364_v59  ;;  %v662_v53 = vadd.f32 %v2436_v38, %v661_v35  ;;  %v2747_v59 = vld [vmem:[#allocation13_spill] sm:$0xff] }
 0x209   : > { %v846_v13 = vmul.f32 %v2747_v59, %v2328_v23 }
 0x20a   : > { %v681_v4 = vmul.f32 0.5, %v662_v53 }
 0x20b   : > { %v1005_v27 = vsub.f32 %v846_v13, %v2558_v58 }
 0x20e   : > { %v1263_v49 = vpop.permute.xlu0 %1262  ;;  %690 = vxpose.xlu0.b32.cont [8/16] (narrow) %v674_v20, 8  ;;  %v1323_v51 = vpop.permute.xlu2 %1322 }
 0x20f   : > { %v955_v21 = vpop.permute.xlu1 %954  ;;  %v664_v14 = vpop.f32.mrf.mxu3 }
 0x210   : > { %v1001_v5 = vsub.f32 %v842_v46, %v955_v21  ;;  %v665_v25 = vadd.f32 %v2436_v38, %v664_v14  ;;  %v2748_v38 = vld [vmem:[#allocation9_spill] sm:$0xff] }
 0x211   : > { %v843_v20 = vmul.f32 %v2748_v38, %v2272_v26 }
 0x212   : > { %1242 = vrot.lane.b32.xlu2 %v1001_v5, %s1833_s11  ;;  %v682_v45 = vmul.f32 0.5, %v665_v25 }
 0x216   : > { %v953_v55 = vpop.permute.xlu0 %952  ;;  %691 = vxpose.xlu0.b32.cont [9/16] (narrow) %v675_v52, 8  ;;  %v1255_v23 = vpop.permute.xlu2 %1254 }
 0x217   : > { %v1000_v30 = vsub.f32 %v841_v0, %v953_v55  ;;  %v1327_v37 = vpop.permute.xlu1 %1326 }
 0x218   : > { %v1363_v11 = vsel %vm776_vm1, %v1263_v49, %v1327_v37 }
 0x219   : > { %1644 = vmatpush.xpose.msk.msrb.mxu2 %vm1368_vm3, %v1363_v11  ;;  %1240 = vrot.lane.b32.xlu1 %v1000_v30, %s1833_s11 }
 0x21e   : > { %v1325_v3 = vpop.permute.xlu0 %1324  ;;  %692 = vxpose.xlu0.b32.cont [10/16] (narrow) %v676_v50, 8  ;;  %v1747_v50 = vld [vmem:[%s398_s20] ss:$0 sm:$0xff]  ;;  %s390_s20 = scalar_lea.vmem [#allocation5], %s1604_s30  ;;  %s1768_s30 = scalar_lea.hbm %s2725_s10, 32 }
 0x21f   : > { %v1161_v17 = vpop.permute.xlu1 %1160  ;;  %v1362_v6 = vsel %vm776_vm1, %v1261_v54, %v1325_v3  ;;  %p1770_p2 = scmp.lt.s32.totalorder %s1768_s30, %s1764_s2 }
 0x220   : > { %v1208_v40 = vadd.f32 %v1161_v17, %v1064_v1  ;;  %1645 = vmatpush.xpose.msk.msrb.mxu2 %vm1368_vm3, %v1362_v6  ;;  %v1454_v17 = vld [vmem:[%s2724_s9] sm:$0xff] }
 0x221   : > { %1469 = vperm.xlu1 %1742, %v1464_v48   ;;  %p1771_p3 = por %p1770_p2, %p1769_p1 }
 0x222   : > { %1304 = vrot.lane.b32.xlu2 %v1208_v40, %s1833_s11 }
 0x223   : > { %p1772_p5 = pnand %p1771_p3, %p1767_p0 }
 0x226   : > { %693 = vxpose.xlu0.b32.cont [11/16] (narrow) %v677_v39, 8  ;;  %v1257_v9 = vpop.permute.xlu0 %1256 }
 0x227   : > { %v1259_v31 = vpop.permute.xlu1 %1258 }
 0x228   : > { %v1361_v12 = vsel %vm776_vm1, %v1259_v31, %v1323_v51  ;;  %v1317_v26 = vpop.permute.xlu2 %1316 }
 0x229   : > { %1646 = vmatpush.xpose.msk.msrb.mxu2 %vm1368_vm3, %v1361_v12 }
 0x22a   : > { %1477 = vperm.xlu2 %1743, %v1464_v48  }
 0x22e   : > { %694 = vxpose.xlu0.b32.cont [12/16] (narrow) %v678_v60, 8 }
 0x230   : > { %v1321_v28 = vpop.permute.xlu1 %1320 }
 0x231   : > { %v1360_v43 = vsel %vm776_vm1, %v1257_v9, %v1321_v28 }
 0x232   : > { %1647 = vmatpush.xpose.msk.msrb.mxu2 %vm1368_vm3, %v1360_v43 }
 0x236   : > { %695 = vxpose.xlu0.b32.cont [13/16] (narrow) %v679_v41, 8 }
 0x238   : > { %v1253_v58 = vpop.permute.xlu1 %1252 }
 0x23e   : > { %696 = vxpose.xlu0.b32.cont [14/16] (narrow) %v680_v15, 8  ;;  %v1249_v46 = vpop.permute.xlu2 %1248 }
 0x246   : > { %697 = vxpose.xlu0.b32.cont [15/16] (narrow) %v681_v4, 8 }
 0x24e   : > { %698 = vxpose.xlu0.b32.end [16/16] (narrow) %v682_v45, 8  ;;  %v1311_v57 = vpop.permute.xlu2 %1310 }
 0x26c   : > { %v1243_v55 = vpop.permute.xlu2 %1242 }
 0x27a   : > { %v699_v36 = vpop.trf.xlu0 }
 0x27b   : > { %715 = vst [vmem:[#allocation3] sm:$0x3] %v699_v36 }
 0x282   : > { %v1461_v40 = vld [vmem:[#allocation3] sm:$0x3] }
 0x283   : > { %v1465_v39 = vperm.slane %v1461_v40, 0  ;;  %v1474_v24 = vperm.slane %v1461_v40, 1 }
 0x2b5   : > { %1741 = vset.pattern.permute.xlu0 %v1834_v44  ;;  %v1002_v44 = vsub.f32 %v843_v20, %v2586_v62  ;;  %v1315_v62 = vpop.permute.xlu1 %1314 }
 0x2bc   : > { %1318 = vrot.lane.b32.xlu0 %v2560_v33, %s1833_s11 }
 0x2bd   : > { %v1247_v21 = vpop.permute.xlu1 %1246 }
 0x2be   : > { %v1355_v56 = vsel %vm776_vm1, %v1247_v21, %v1311_v57 }
 0x2c4   : > { %1250 = vrot.lane.b32.xlu0 %v1005_v27, %s1833_s11 }
 0x2c5   : > { %v1309_v52 = vpop.permute.xlu1 %1308 }
 0x2cc   : > { %1312 = vrot.lane.b32.xlu0 %v2572_v8, %s1833_s11  ;;  %v1358_v8 = vsel %vm776_vm1, %v1253_v58, %v1317_v26 }
 0x2cd   : > { %v1241_v16 = vpop.permute.xlu1 %1240 }
 0x2d4   : > { %1244 = vrot.lane.b32.xlu0 %v1002_v44, %s1833_s11 }
 0x2d5   : > { %v1470_v12 = vpop.permute.xlu1 %1469 }
 0x2dc   : > { %1306 = vrot.lane.b32.xlu0 %v2599_v63, %s1833_s11  ;;  %s1498_s11 = sshll.u32 %s390_s20, 4  ;;  %s1499_s11 = int_to_ptr.vmem [resolvable:$true] %s1498_s11 }
 0x2e4   : > { %1445 = vperm.xlu0 %1741, %v1441_v32  }
 0x2ec   : > { %1744 = vset.pattern.permute.xlu0 %v1835_v7  ;;  %v1305_v7 = vpop.permute.xlu2 %1304 }
 0x2ed   : > { %v1352_v11 = vsel %vm776_vm1, %v1241_v16, %v1305_v7 }
 0x2f4   : > { %v1478_v2 = vpop.permute.xlu2 %1477 }
 0x32e   : > { %v1319_v33 = vpop.permute.xlu0 %1318 }
 0x32f   : > { %v1359_v42 = vsel %vm776_vm1, %v1255_v23, %v1319_v33 }
 0x330   : > { %1648 = vmatpush.xpose.msk.msrb.mxu2 %vm1368_vm3, %v1359_v42 }
 0x334   : > { %1649 = vmatpush.xpose.msk.msrb.mxu2 %vm1368_vm3, %v1358_v8 }
 0x336   : > { %v1251_v49 = vpop.permute.xlu0 %1250 }
 0x337   : > { %v1357_v63 = vsel %vm776_vm1, %v1251_v49, %v1315_v62 }
 0x338   : > { %1650 = vmatpush.xpose.msk.msrb.mxu2 %vm1368_vm3, %v1357_v63 }
 0x33e   : > { %v1313_v18 = vpop.permute.xlu0 %1312 }
 0x33f   : > { %v1356_v5 = vsel %vm776_vm1, %v1249_v46, %v1313_v18 }
 0x340   : > { %1651 = vmatpush.xpose.msk.msrb.mxu2 %vm1368_vm3, %v1356_v5 }
 0x344   : > { %1652 = vmatpush.xpose.msk.msrb.mxu2 %vm1368_vm3, %v1355_v56 }
 0x346   : > { %v1245_v19 = vpop.permute.xlu0 %1244 }
 0x347   : > { %v1354_v0 = vsel %vm776_vm1, %v1245_v19, %v1309_v52 }
 0x348   : > { %1653 = vmatpush.xpose.msk.msrb.mxu2 %vm1368_vm3, %v1354_v0 }
 0x34e   : > { %v1307_v30 = vpop.permute.xlu0 %1306 }
 0x34f   : > { %v1353_v37 = vsel %vm776_vm1, %v1243_v55, %v1307_v30 }
 0x350   : > { %1654 = vmatpush.xpose.msk.msrb.mxu2 %vm1368_vm3, %v1353_v37 }
 0x354   : > { %1655 = vmatpush.xpose.msk.msrb.mxu2 %vm1368_vm3, %v1352_v11 }
 0x356   : > { %v1446_v10 = vpop.permute.xlu0 %1445 }
 0x357   : > { %1656 = vmatmul.msk.f32.vlgmr.msrb.gmra.mxu2 %vm1368_vm3, %v2416_v29  ;;  %v1451_v54 = vmul.f32 %v1747_v50, %v1446_v10 }
 0x359   : > { %v1452_v1 = vsub.f32 1.0, %v1451_v54 }
 0x35b   : > { %v1453_v3 = vmul.f32 1e+12, %v1452_v1 }
 0x35d   : > { %v1455_v6 = vadd.f32 %v1454_v17, %v1453_v3 }
 0x3da   : > { %v1437_v22 = vpop.f32.mrf.mxu2 }
 0x3db   : > { %v1440_v29 = vmul.f32 0.25, %v1437_v22 }
 0x3dd   : > { %v1456_v48 = vsub.f32 %v1440_v29, %v1455_v6 }
 0x3df   : > { %v1466_v51 = vadd.f32 %v1465_v39, %v1456_v48  ;;  %v1475_v31 = vadd.f32 %v1474_v24, %v1456_v48 }
 0x3e1   : > { %v1472_v60 = vadd.f32 %v1470_v12, %v1466_v51  ;;  %v1480_v34 = vadd.f32 %v1478_v2, %v1475_v31 }
 0x3e3   : > { %1473 = vst [vmem:[%s390_s20] sm:$0xff] %v1472_v60 }
 0x3e4   : > { %1657 = vst [vmem:[%s390_s20 + $0x8] sm:$0xff] %v1480_v34 }
 0x3e5   : > { %1775 = shalt.err (!%p1772_p5)
}
 0x3e6   : > { %s1836_s22 = smov 128  }
 0x3e7   : > { %1677 = dma.vmem_to_hbm [thread:$0]  (%p1932_p4), %s1499_s11, 256, %s1501_s12, %s1484_s16, %s1836_s22, %s1836_s22, %s2741_s27  }
 0x3e8 PF: > { %p1683_p6 = scmp.ge.s32.totalorder %s1826_s18, 2  ;;  %s1515_s20 = sand.u32 1, %s1806_s13  }
 0x3e9   : > { %s1516_s28 = scalar_lea.sflag [#allocation6], %s1515_s20 }
 0x3ea   : > { %p1680_p7 = pnand %p1683_p6, %p1939_p8 }
 0x3ec   : > { %p1681_p9 = pneg %p1680_p7 }
 0x3ee   : > { %1801 = dma.done.wait (%p1681_p9), %s1516_s28, 256  }
 0x3ef   : > { %1803 = vsyncadd (%p1681_p9), %s1516_s28, 4294967040  ;;  %s23_s18 = sadd.s32 1, %s1826_s18   ;;  %s2750_s13 = smov %s1810_s14 }
 0x3f0   : > { %p20_p10 = scmp.ge.s32.totalorder %s23_s18, 4   ;;  %s2751_s14 = smov %s1814_s15 }
 0x3f1   : > { %s2752_s15 = smov %s1945_s26  ;;  %s2753_s16 = smov %s1822_s17 }
 0x3f2   : > { %s2754_s17 = smov %s2756_s21  ;;  %22 = sbr.rel (!%p20_p10) target bundleno = 7 (0x7), region = 108 }
 0x3f7   :  { %1522 = vsyncpa [#allocation6], 1 }
 0x3f8   :  { %1524 = vsyncpa [#allocation6 + $0x1], 1 }

</bundles_post_ra>
